<compile_context>
chip_gen: v7x
topology: tpu7x:2x2x1
jax: 0.10.0
libtpu: 0.0.40
codegen_flags: <defaults>
</compile_context>

<pallas_src>
import functools

import jax
import jax.numpy as jnp
from jax.experimental import pallas as pl
from jax.experimental.pallas import tpu as pltpu


def _vmem_limit_bytes():
    """Generation-aware scoped-VMEM limit (leave headroom for Mosaic scratch)."""
    try:
        cap = int(pltpu.get_tpu_info().vmem_capacity_bytes)
    except Exception:
        cap = 64 * 1024 * 1024
    return max(32 * 1024 * 1024, (cap * 3) // 4)


def _pick_tile(n, target):
    """Largest multiple-of-16 divisor of n that is <= target, else n itself."""
    if n <= target:
        return n
    t = (target // 16) * 16
    while t >= 16:
        if n % t == 0:
            return t
        t -= 16
    return n


# ----------------------------------------------------------------------------
# Fused kernel: qkv projection + attention + output projection, all in VMEM.
# ----------------------------------------------------------------------------
def _fused_attn_kernel(x_ref, wq_ref, wk_ref, wv_ref, wo_ref, b_ref, o_ref,
                       k_scr, v_scr, *, num_heads, head_dim, q_tile, kv_chunk):
    qi = pl.program_id(1)
    n_kv, dim = k_scr.shape

    # --- K / V projection for the whole batch row, once per batch (qi == 0),
    #     kept resident in VMEM scratch for every q tile of this batch. -------
    @pl.when(qi == 0)
    def _():
        wk = wk_ref[...]
        wv = wv_ref[...]
        # Static chunking bounds vreg live ranges for large N.
        for c0 in range(0, n_kv, kv_chunk):
            xc = x_ref[0, c0:c0 + kv_chunk, :]                    # (chunk, C) bf16
            k_scr[c0:c0 + kv_chunk, :] = jnp.dot(
                xc, wk, preferred_element_type=jnp.float32).astype(k_scr.dtype)
            v_scr[c0:c0 + kv_chunk, :] = jnp.dot(
                xc, wv, preferred_element_type=jnp.float32).astype(v_scr.dtype)

    # --- Q projection for this q tile (attention scale pre-folded into Wq). --
    q_start = pl.multiple_of(qi * q_tile, q_tile)
    xq = x_ref[0, pl.ds(q_start, q_tile), :]                      # (tq, C) bf16
    q = jnp.dot(xq, wq_ref[...],
                preferred_element_type=jnp.float32).astype(jnp.bfloat16)

    # --- Per-head attention; head merge folded into the output projection. ---
    acc = jnp.zeros((q_tile, dim), jnp.float32)
    for h in range(num_heads):
        lo = h * head_dim
        hi = lo + head_dim
        q_h = q[:, lo:hi]                                         # (tq, hd) bf16
        k_h = k_scr[:, lo:hi]                                     # (N,  hd) bf16
        v_h = v_scr[:, lo:hi]                                     # (N,  hd) bf16

        # scores: (tq, N) f32 on the MXU (contraction over hd, no transposes)
        s = jnp.einsum('qd,kd->qk', q_h, k_h,
                       preferred_element_type=jnp.float32)

        # single-pass softmax (full K/V resident -> no online rescale needed)
        m = jnp.max(s, axis=-1, keepdims=True)
        p = jnp.exp(s - m)                                        # f32 (EUP)
        l = jnp.sum(p, axis=-1, keepdims=True)

        o_h = jnp.einsum('qk,kd->qd', p.astype(jnp.bfloat16), v_h,
                         preferred_element_type=jnp.float32)      # (tq, hd) f32
        o_h = o_h * pl.reciprocal(l, approx=True)                 # normalise

        # concat-over-heads folded into the projection:
        #   out += o_h @ Wproj[h*hd:(h+1)*hd, :]
        acc = acc + jnp.dot(o_h.astype(jnp.bfloat16), wo_ref[lo:hi, :],
                            preferred_element_type=jnp.float32)

    o_ref[0] = (acc + b_ref[...]).astype(o_ref.dtype)             # lane-dense C


def pallas_attention(x, wq, wkv, wproj, bproj, *, num_heads, scale,
                     q_tile_target=512):
    B, N, C = x.shape
    head_dim = C // num_heads
    cdtype = jnp.bfloat16

    # Split Wkv on the host (no unaligned lane slicing in-kernel) and fold the
    # attention scale into Wq.  MXU operands are bf16, bias kept in f32.
    wk = wkv[:, :C]
    wv = wkv[:, C:]
    wq_c = (wq * scale).astype(cdtype)
    wk_c = wk.astype(cdtype)
    wv_c = wv.astype(cdtype)
    wo_c = wproj.astype(cdtype)
    bias = bproj.astype(jnp.float32).reshape(1, C)
    x_c = x.astype(cdtype)

    q_tile = _pick_tile(N, q_tile_target)
    kv_chunk = _pick_tile(N, 512)

    kernel = functools.partial(_fused_attn_kernel, num_heads=num_heads,
                               head_dim=head_dim, q_tile=q_tile,
                               kv_chunk=kv_chunk)

    const_spec = pl.BlockSpec((C, C), lambda b, qi: (0, 0))
    out = pl.pallas_call(
        kernel,
        out_shape=jax.ShapeDtypeStruct((B, N, C), x.dtype),
        grid=(B, N // q_tile),
        in_specs=[
            pl.BlockSpec((1, N, C), lambda b, qi: (b, 0, 0)),     # x (full seq)
            const_spec,                                           # Wq*scale
            const_spec,                                           # Wk
            const_spec,                                           # Wv
            const_spec,                                           # Wproj
            pl.BlockSpec((1, C), lambda b, qi: (0, 0)),           # bias (f32)
        ],
        out_specs=pl.BlockSpec((1, q_tile, C), lambda b, qi: (b, qi, 0)),
        scratch_shapes=[
            pltpu.VMEM((N, C), cdtype),                           # K resident
            pltpu.VMEM((N, C), cdtype),                           # V resident
        ],
        compiler_params=pltpu.CompilerParams(
            dimension_semantics=("parallel", "arbitrary"),
            vmem_limit_bytes=_vmem_limit_bytes()),
    )(x_c, wq_c, wk_c, wv_c, wo_c, bias)
    return out


def reference_attention(x, wq, wkv, wproj, bproj, *, num_heads, scale):
    """Pure-JAX f32 reference mirroring the PyTorch forward (sr_ratio <= 4)."""
    B, N, C = x.shape
    hd = C // num_heads
    q = x @ wq
    kv = x @ wkv
    k, v = kv[..., :C], kv[..., C:]
    q = q.reshape(B, N, num_heads, hd).transpose(0, 2, 1, 3)
    k = k.reshape(B, N, num_heads, hd).transpose(0, 2, 1, 3)
    v = v.reshape(B, N, num_heads, hd).transpose(0, 2, 1, 3)
    attn = jnp.einsum('bhqd,bhkd->bhqk', q, k) * scale
    attn = jax.nn.softmax(attn, axis=-1)
    out = jnp.einsum('bhqk,bhkd->bhqd', attn, v)
    out = out.transpose(0, 2, 1, 3).reshape(B, N, C)
    return out @ wproj + bproj


if __name__ == "__main__":
    # Module-consistent small shapes: B=2, H=W=8 -> N=64 tokens, dim C=64,
    # num_heads=4 (head_dim=16), sr_ratio=1 (default kv path), qkv_bias=False.
    B, Hs, Ws, C = 2, 8, 8, 64
    N = Hs * Ws
    num_heads = 4
    head_dim = C // num_heads
    scale = head_dim ** (-0.5)

    key = jax.random.PRNGKey(0)
    kx, kq, kkv, kp, kb = jax.random.split(key, 5)

    x = jax.random.normal(kx, (B, N, C), dtype=jnp.float32)
    # Deterministic synthetic parameters, stored as (in, out) for x @ W.
    wq = 0.02 * jax.random.normal(kq, (C, C), dtype=jnp.float32)
    wkv = 0.02 * jax.random.normal(kkv, (C, 2 * C), dtype=jnp.float32)
    wproj = 0.02 * jax.random.normal(kp, (C, C), dtype=jnp.float32)
    bproj = 0.02 * jax.random.normal(kb, (C,), dtype=jnp.float32)

    out = pallas_attention(x, wq, wkv, wproj, bproj,
                           num_heads=num_heads, scale=scale)
    out = jax.block_until_ready(out)

    ref = reference_attention(x, wq, wkv, wproj, bproj,
                              num_heads=num_heads, scale=scale)
    assert out.shape == (B, N, C)
    # bf16 MXU operands (f32 softmax stats / accumulators) -> loosened tol.
    assert jnp.allclose(out, ref, atol=2e-2, rtol=2e-2), "mismatch vs reference"

    print("KERNEL_OK")
</pallas_src>

<mosaic_0001>
module attributes {stable_mosaic.version = 11 : i64} {
  func.func @_fused_attn_kernel(%arg0: i32, %arg1: i32, %arg2: memref<1x64x64xbf16, #tpu.memory_space<vmem>>, %arg3: memref<64x64xbf16, #tpu.memory_space<vmem>>, %arg4: memref<64x64xbf16, #tpu.memory_space<vmem>>, %arg5: memref<64x64xbf16, #tpu.memory_space<vmem>>, %arg6: memref<64x64xbf16, #tpu.memory_space<vmem>>, %arg7: memref<1x64xf32, #tpu.memory_space<vmem>>, %arg8: memref<1x64x64xf32, #tpu.memory_space<vmem>>, %arg9: memref<64x64xbf16, #tpu.memory_space<vmem>>, %arg10: memref<64x64xbf16, #tpu.memory_space<vmem>>) attributes {dimension_semantics = [#tpu.dimension_semantics<parallel>, #tpu.dimension_semantics<arbitrary>], iteration_bounds = array<i64: 2, 1>, scalar_prefetch = 0 : i64, scratch_operands = 2 : i64, tpu.core_type = #tpu.core_type<tc>, window_params = [{transform_indices = @transform_0, window_bounds = array<i64: 1, 64, 64>}, {pipeline_mode = #tpu.pipeline_mode<synchronous>, transform_indices = @transform_1, window_bounds = array<i64: 64, 64>}, {pipeline_mode = #tpu.pipeline_mode<synchronous>, transform_indices = @transform_2, window_bounds = array<i64: 64, 64>}, {pipeline_mode = #tpu.pipeline_mode<synchronous>, transform_indices = @transform_3, window_bounds = array<i64: 64, 64>}, {pipeline_mode = #tpu.pipeline_mode<synchronous>, transform_indices = @transform_4, window_bounds = array<i64: 64, 64>}, {pipeline_mode = #tpu.pipeline_mode<synchronous>, transform_indices = @transform_5, window_bounds = array<i64: 1, 64>}, {transform_indices = @transform_6, window_bounds = array<i64: 1, 64, 64>}]} {
    %c0_i32 = arith.constant 0 : i32
    %0 = arith.cmpi eq, %arg1, %c0_i32 : i32
    %1 = arith.extui %0 : i1 to i32
    %c0_i32_0 = arith.constant 0 : i32
    %2 = arith.cmpi ne, %1, %c0_i32_0 : i32
    scf.if %2 {
      %c0_51 = arith.constant 0 : index
      %c0_52 = arith.constant 0 : index
      %98 = vector.load %arg4[%c0_51, %c0_52] : memref<64x64xbf16, #tpu.memory_space<vmem>>, vector<64x64xbf16>
      %c0_53 = arith.constant 0 : index
      %c0_54 = arith.constant 0 : index
      %99 = vector.load %arg5[%c0_53, %c0_54] : memref<64x64xbf16, #tpu.memory_space<vmem>>, vector<64x64xbf16>
      %c0_55 = arith.constant 0 : index
      %c0_56 = arith.constant 0 : index
      %c0_57 = arith.constant 0 : index
      %100 = vector.load %arg2[%c0_55, %c0_56, %c0_57] : memref<1x64x64xbf16, #tpu.memory_space<vmem>>, vector<1x64x64xbf16>
      %101 = vector.shape_cast %100 : vector<1x64x64xbf16> to vector<64x64xbf16>
      %cst_58 = arith.constant dense<0.000000e+00> : vector<64x64xf32>
      %102 = tpu.matmul %101, %98, %cst_58 {dimension_numbers = #tpu.dot_dimension_numbers<[1], [0], [0], [1], [0, 0, 1, 1], [], []>} : vector<64x64xbf16>, vector<64x64xbf16>, vector<64x64xf32> -> vector<64x64xf32>
      %103 = arith.truncf %102 : vector<64x64xf32> to vector<64x64xbf16>
      %c0_59 = arith.constant 0 : index
      %c0_60 = arith.constant 0 : index
      %104 = vector.load %arg9[%c0_59, %c0_60] : memref<64x64xbf16, #tpu.memory_space<vmem>>, vector<64x64xbf16>
      tpu.vector_store %arg9[%c0_59, %c0_60], %103 {strides = array<i32>} : memref<64x64xbf16, #tpu.memory_space<vmem>>, vector<64x64xbf16>,
      %cst_61 = arith.constant dense<0.000000e+00> : vector<64x64xf32>
      %105 = tpu.matmul %101, %99, %cst_61 {dimension_numbers = #tpu.dot_dimension_numbers<[1], [0], [0], [1], [0, 0, 1, 1], [], []>} : vector<64x64xbf16>, vector<64x64xbf16>, vector<64x64xf32> -> vector<64x64xf32>
      %106 = arith.truncf %105 : vector<64x64xf32> to vector<64x64xbf16>
      %c0_62 = arith.constant 0 : index
      %c0_63 = arith.constant 0 : index
      %107 = vector.load %arg10[%c0_62, %c0_63] : memref<64x64xbf16, #tpu.memory_space<vmem>>, vector<64x64xbf16>
      tpu.vector_store %arg10[%c0_62, %c0_63], %106 {strides = array<i32>} : memref<64x64xbf16, #tpu.memory_space<vmem>>, vector<64x64xbf16>,
    } else {
    }
    %c64_i32 = arith.constant 64 : i32
    %3 = arith.muli %arg1, %c64_i32 : i32
    %4 = tpu.assume_multiple %3, 64 : i32
    %c0 = arith.constant 0 : index
    %5 = arith.index_cast %4 : i32 to index
    %c0_1 = arith.constant 0 : index
    %6 = vector.load %arg2[%c0, %5, %c0_1] : memref<1x64x64xbf16, #tpu.memory_space<vmem>>, vector<1x64x64xbf16>
    %7 = vector.shape_cast %6 : vector<1x64x64xbf16> to vector<64x64xbf16>
    %c0_2 = arith.constant 0 : index
    %c0_3 = arith.constant 0 : index
    %8 = vector.load %arg3[%c0_2, %c0_3] : memref<64x64xbf16, #tpu.memory_space<vmem>>, vector<64x64xbf16>
    %cst = arith.constant dense<0.000000e+00> : vector<64x64xf32>
    %9 = tpu.matmul %7, %8, %cst {dimension_numbers = #tpu.dot_dimension_numbers<[1], [0], [0], [1], [0, 0, 1, 1], [], []>} : vector<64x64xbf16>, vector<64x64xbf16>, vector<64x64xf32> -> vector<64x64xf32>
    %10 = arith.truncf %9 : vector<64x64xf32> to vector<64x64xbf16>
    %cst_4 = arith.constant 0.000000e+00 : f32
    %11 = vector.broadcast %cst_4 : f32 to vector<64x64xf32>
    %12 = vector.extract_strided_slice %10 {offsets = [0, 0], sizes = [64, 16], strides = [1, 1]} : vector<64x64xbf16> to vector<64x16xbf16>
    %c0_5 = arith.constant 0 : index
    %c0_6 = arith.constant 0 : index
    %13 = vector.load %arg9[%c0_5, %c0_6] : memref<64x64xbf16, #tpu.memory_space<vmem>>, vector<64x16xbf16>
    %c0_7 = arith.constant 0 : index
    %c0_8 = arith.constant 0 : index
    %14 = vector.load %arg10[%c0_7, %c0_8] : memref<64x64xbf16, #tpu.memory_space<vmem>>, vector<64x16xbf16>
    "tpu.trace_start"() <{level = 10 : i32, message = "qd,kd->qk"}> : () -> ()
    %cst_9 = arith.constant dense<0.000000e+00> : vector<64x64xf32>
    %15 = tpu.matmul %12, %13, %cst_9 {dimension_numbers = #tpu.dot_dimension_numbers<[1], [1], [0], [0], [0, 0, 1, 0], [], []>} : vector<64x16xbf16>, vector<64x16xbf16>, vector<64x64xf32> -> vector<64x64xf32>
    "tpu.trace_stop"() : () -> ()
    %cst_10 = arith.constant dense<0xFF800000> : vector<64xf32>
    %16 = vector.multi_reduction <maximumf>, %15, %cst_10 [1] : vector<64x64xf32> to vector<64xf32>
    %17 = vector.shape_cast %16 : vector<64xf32> to vector<64x1xf32>
    %18 = vector.broadcast %17 : vector<64x1xf32> to vector<64x64xf32>
    %19 = arith.subf %15, %18 : vector<64x64xf32>
    %20 = math.exp %19 : vector<64x64xf32>
    %cst_11 = arith.constant dense<0.000000e+00> : vector<64xf32>
    %21 = vector.multi_reduction <add>, %20, %cst_11 [1] : vector<64x64xf32> to vector<64xf32>
    %22 = vector.shape_cast %21 : vector<64xf32> to vector<64x1xf32>
    %23 = arith.truncf %20 : vector<64x64xf32> to vector<64x64xbf16>
    "tpu.trace_start"() <{level = 10 : i32, message = "qk,kd->qd"}> : () -> ()
    %cst_12 = arith.constant dense<0.000000e+00> : vector<64x16xf32>
    %24 = tpu.matmul %23, %14, %cst_12 {dimension_numbers = #tpu.dot_dimension_numbers<[1], [0], [0], [1], [0, 0, 1, 1], [], []>} : vector<64x64xbf16>, vector<64x16xbf16>, vector<64x16xf32> -> vector<64x16xf32>
    "tpu.trace_stop"() : () -> ()
    %25 = tpu.reciprocal %22 {approx = true} : vector<64x1xf32> -> vector<64x1xf32>
    %26 = vector.broadcast %25 : vector<64x1xf32> to vector<64x16xf32>
    %27 = arith.mulf %24, %26 : vector<64x16xf32>
    %28 = arith.truncf %27 : vector<64x16xf32> to vector<64x16xbf16>
    %c0_13 = arith.constant 0 : index
    %c0_14 = arith.constant 0 : index
    %29 = vector.load %arg6[%c0_13, %c0_14] : memref<64x64xbf16, #tpu.memory_space<vmem>>, vector<16x64xbf16>
    %cst_15 = arith.constant dense<0.000000e+00> : vector<64x64xf32>
    %30 = tpu.matmul %28, %29, %cst_15 {dimension_numbers = #tpu.dot_dimension_numbers<[1], [0], [0], [1], [0, 0, 1, 1], [], []>} : vector<64x16xbf16>, vector<16x64xbf16>, vector<64x64xf32> -> vector<64x64xf32>
    %31 = arith.addf %11, %30 : vector<64x64xf32>
    %32 = vector.extract_strided_slice %10 {offsets = [0, 16], sizes = [64, 16], strides = [1, 1]} : vector<64x64xbf16> to vector<64x16xbf16>
    %c0_16 = arith.constant 0 : index
    %c16 = arith.constant 16 : index
    %33 = vector.load %arg9[%c0_16, %c16] : memref<64x64xbf16, #tpu.memory_space<vmem>>, vector<64x16xbf16>
    %c0_17 = arith.constant 0 : index
    %c16_18 = arith.constant 16 : index
    %34 = vector.load %arg10[%c0_17, %c16_18] : memref<64x64xbf16, #tpu.memory_space<vmem>>, vector<64x16xbf16>
    "tpu.trace_start"() <{level = 10 : i32, message = "qd,kd->qk"}> : () -> ()
    %cst_19 = arith.constant dense<0.000000e+00> : vector<64x64xf32>
    %35 = tpu.matmul %32, %33, %cst_19 {dimension_numbers = #tpu.dot_dimension_numbers<[1], [1], [0], [0], [0, 0, 1, 0], [], []>} : vector<64x16xbf16>, vector<64x16xbf16>, vector<64x64xf32> -> vector<64x64xf32>
    "tpu.trace_stop"() : () -> ()
    %cst_20 = arith.constant dense<0xFF800000> : vector<64xf32>
    %36 = vector.multi_reduction <maximumf>, %35, %cst_20 [1] : vector<64x64xf32> to vector<64xf32>
    %37 = vector.shape_cast %36 : vector<64xf32> to vector<64x1xf32>
    %38 = vector.broadcast %37 : vector<64x1xf32> to vector<64x64xf32>
    %39 = arith.subf %35, %38 : vector<64x64xf32>
    %40 = math.exp %39 : vector<64x64xf32>
    %cst_21 = arith.constant dense<0.000000e+00> : vector<64xf32>
    %41 = vector.multi_reduction <add>, %40, %cst_21 [1] : vector<64x64xf32> to vector<64xf32>
    %42 = vector.shape_cast %41 : vector<64xf32> to vector<64x1xf32>
    %43 = arith.truncf %40 : vector<64x64xf32> to vector<64x64xbf16>
    "tpu.trace_start"() <{level = 10 : i32, message = "qk,kd->qd"}> : () -> ()
    %cst_22 = arith.constant dense<0.000000e+00> : vector<64x16xf32>
    %44 = tpu.matmul %43, %34, %cst_22 {dimension_numbers = #tpu.dot_dimension_numbers<[1], [0], [0], [1], [0, 0, 1, 1], [], []>} : vector<64x64xbf16>, vector<64x16xbf16>, vector<64x16xf32> -> vector<64x16xf32>
    "tpu.trace_stop"() : () -> ()
    %45 = tpu.reciprocal %42 {approx = true} : vector<64x1xf32> -> vector<64x1xf32>
    %46 = vector.broadcast %45 : vector<64x1xf32> to vector<64x16xf32>
    %47 = arith.mulf %44, %46 : vector<64x16xf32>
    %48 = arith.truncf %47 : vector<64x16xf32> to vector<64x16xbf16>
    %c16_23 = arith.constant 16 : index
    %c0_24 = arith.constant 0 : index
    %49 = vector.load %arg6[%c16_23, %c0_24] : memref<64x64xbf16, #tpu.memory_space<vmem>>, vector<16x64xbf16>
    %cst_25 = arith.constant dense<0.000000e+00> : vector<64x64xf32>
    %50 = tpu.matmul %48, %49, %cst_25 {dimension_numbers = #tpu.dot_dimension_numbers<[1], [0], [0], [1], [0, 0, 1, 1], [], []>} : vector<64x16xbf16>, vector<16x64xbf16>, vector<64x64xf32> -> vector<64x64xf32>
    %51 = arith.addf %31, %50 : vector<64x64xf32>
    %52 = vector.extract_strided_slice %10 {offsets = [0, 32], sizes = [64, 16], strides = [1, 1]} : vector<64x64xbf16> to vector<64x16xbf16>
    %c0_26 = arith.constant 0 : index
    %c32 = arith.constant 32 : index
    %53 = vector.load %arg9[%c0_26, %c32] : memref<64x64xbf16, #tpu.memory_space<vmem>>, vector<64x16xbf16>
    %c0_27 = arith.constant 0 : index
    %c32_28 = arith.constant 32 : index
    %54 = vector.load %arg10[%c0_27, %c32_28] : memref<64x64xbf16, #tpu.memory_space<vmem>>, vector<64x16xbf16>
    "tpu.trace_start"() <{level = 10 : i32, message = "qd,kd->qk"}> : () -> ()
    %cst_29 = arith.constant dense<0.000000e+00> : vector<64x64xf32>
    %55 = tpu.matmul %52, %53, %cst_29 {dimension_numbers = #tpu.dot_dimension_numbers<[1], [1], [0], [0], [0, 0, 1, 0], [], []>} : vector<64x16xbf16>, vector<64x16xbf16>, vector<64x64xf32> -> vector<64x64xf32>
    "tpu.trace_stop"() : () -> ()
    %cst_30 = arith.constant dense<0xFF800000> : vector<64xf32>
    %56 = vector.multi_reduction <maximumf>, %55, %cst_30 [1] : vector<64x64xf32> to vector<64xf32>
    %57 = vector.shape_cast %56 : vector<64xf32> to vector<64x1xf32>
    %58 = vector.broadcast %57 : vector<64x1xf32> to vector<64x64xf32>
    %59 = arith.subf %55, %58 : vector<64x64xf32>
    %60 = math.exp %59 : vector<64x64xf32>
    %cst_31 = arith.constant dense<0.000000e+00> : vector<64xf32>
    %61 = vector.multi_reduction <add>, %60, %cst_31 [1] : vector<64x64xf32> to vector<64xf32>
    %62 = vector.shape_cast %61 : vector<64xf32> to vector<64x1xf32>
    %63 = arith.truncf %60 : vector<64x64xf32> to vector<64x64xbf16>
    "tpu.trace_start"() <{level = 10 : i32, message = "qk,kd->qd"}> : () -> ()
    %cst_32 = arith.constant dense<0.000000e+00> : vector<64x16xf32>
    %64 = tpu.matmul %63, %54, %cst_32 {dimension_numbers = #tpu.dot_dimension_numbers<[1], [0], [0], [1], [0, 0, 1, 1], [], []>} : vector<64x64xbf16>, vector<64x16xbf16>, vector<64x16xf32> -> vector<64x16xf32>
    "tpu.trace_stop"() : () -> ()
    %65 = tpu.reciprocal %62 {approx = true} : vector<64x1xf32> -> vector<64x1xf32>
    %66 = vector.broadcast %65 : vector<64x1xf32> to vector<64x16xf32>
    %67 = arith.mulf %64, %66 : vector<64x16xf32>
    %68 = arith.truncf %67 : vector<64x16xf32> to vector<64x16xbf16>
    %c32_33 = arith.constant 32 : index
    %c0_34 = arith.constant 0 : index
    %69 = vector.load %arg6[%c32_33, %c0_34] : memref<64x64xbf16, #tpu.memory_space<vmem>>, vector<16x64xbf16>
    %cst_35 = arith.constant dense<0.000000e+00> : vector<64x64xf32>
    %70 = tpu.matmul %68, %69, %cst_35 {dimension_numbers = #tpu.dot_dimension_numbers<[1], [0], [0], [1], [0, 0, 1, 1], [], []>} : vector<64x16xbf16>, vector<16x64xbf16>, vector<64x64xf32> -> vector<64x64xf32>
    %71 = arith.addf %51, %70 : vector<64x64xf32>
    %72 = vector.extract_strided_slice %10 {offsets = [0, 48], sizes = [64, 16], strides = [1, 1]} : vector<64x64xbf16> to vector<64x16xbf16>
    %c0_36 = arith.constant 0 : index
    %c48 = arith.constant 48 : index
    %73 = vector.load %arg9[%c0_36, %c48] : memref<64x64xbf16, #tpu.memory_space<vmem>>, vector<64x16xbf16>
    %c0_37 = arith.constant 0 : index
    %c48_38 = arith.constant 48 : index
    %74 = vector.load %arg10[%c0_37, %c48_38] : memref<64x64xbf16, #tpu.memory_space<vmem>>, vector<64x16xbf16>
    "tpu.trace_start"() <{level = 10 : i32, message = "qd,kd->qk"}> : () -> ()
    %cst_39 = arith.constant dense<0.000000e+00> : vector<64x64xf32>
    %75 = tpu.matmul %72, %73, %cst_39 {dimension_numbers = #tpu.dot_dimension_numbers<[1], [1], [0], [0], [0, 0, 1, 0], [], []>} : vector<64x16xbf16>, vector<64x16xbf16>, vector<64x64xf32> -> vector<64x64xf32>
    "tpu.trace_stop"() : () -> ()
    %cst_40 = arith.constant dense<0xFF800000> : vector<64xf32>
    %76 = vector.multi_reduction <maximumf>, %75, %cst_40 [1] : vector<64x64xf32> to vector<64xf32>
    %77 = vector.shape_cast %76 : vector<64xf32> to vector<64x1xf32>
    %78 = vector.broadcast %77 : vector<64x1xf32> to vector<64x64xf32>
    %79 = arith.subf %75, %78 : vector<64x64xf32>
    %80 = math.exp %79 : vector<64x64xf32>
    %cst_41 = arith.constant dense<0.000000e+00> : vector<64xf32>
    %81 = vector.multi_reduction <add>, %80, %cst_41 [1] : vector<64x64xf32> to vector<64xf32>
    %82 = vector.shape_cast %81 : vector<64xf32> to vector<64x1xf32>
    %83 = arith.truncf %80 : vector<64x64xf32> to vector<64x64xbf16>
    "tpu.trace_start"() <{level = 10 : i32, message = "qk,kd->qd"}> : () -> ()
    %cst_42 = arith.constant dense<0.000000e+00> : vector<64x16xf32>
    %84 = tpu.matmul %83, %74, %cst_42 {dimension_numbers = #tpu.dot_dimension_numbers<[1], [0], [0], [1], [0, 0, 1, 1], [], []>} : vector<64x64xbf16>, vector<64x16xbf16>, vector<64x16xf32> -> vector<64x16xf32>
    "tpu.trace_stop"() : () -> ()
    %85 = tpu.reciprocal %82 {approx = true} : vector<64x1xf32> -> vector<64x1xf32>
    %86 = vector.broadcast %85 : vector<64x1xf32> to vector<64x16xf32>
    %87 = arith.mulf %84, %86 : vector<64x16xf32>
    %88 = arith.truncf %87 : vector<64x16xf32> to vector<64x16xbf16>
    %c48_43 = arith.constant 48 : index
    %c0_44 = arith.constant 0 : index
    %89 = vector.load %arg6[%c48_43, %c0_44] : memref<64x64xbf16, #tpu.memory_space<vmem>>, vector<16x64xbf16>
    %cst_45 = arith.constant dense<0.000000e+00> : vector<64x64xf32>
    %90 = tpu.matmul %88, %89, %cst_45 {dimension_numbers = #tpu.dot_dimension_numbers<[1], [0], [0], [1], [0, 0, 1, 1], [], []>} : vector<64x16xbf16>, vector<16x64xbf16>, vector<64x64xf32> -> vector<64x64xf32>
    %91 = arith.addf %71, %90 : vector<64x64xf32>
    %c0_46 = arith.constant 0 : index
    %c0_47 = arith.constant 0 : index
    %92 = vector.load %arg7[%c0_46, %c0_47] : memref<1x64xf32, #tpu.memory_space<vmem>>, vector<1x64xf32>
    %93 = vector.broadcast %92 : vector<1x64xf32> to vector<64x64xf32>
    %94 = arith.addf %91, %93 : vector<64x64xf32>
    %c0_48 = arith.constant 0 : index
    %c0_49 = arith.constant 0 : index
    %c0_50 = arith.constant 0 : index
    %95 = vector.load %arg8[%c0_48, %c0_49, %c0_50] : memref<1x64x64xf32, #tpu.memory_space<vmem>>, vector<1x64x64xf32>
    %96 = vector.shape_cast %95 : vector<1x64x64xf32> to vector<64x64xf32>
    %97 = vector.shape_cast %94 : vector<64x64xf32> to vector<1x64x64xf32>
    tpu.vector_store %arg8[%c0_48, %c0_49, %c0_50], %97 {strides = array<i32>} : memref<1x64x64xf32, #tpu.memory_space<vmem>>, vector<1x64x64xf32>,
    return
  }
  func.func @transform_0(%arg0: i32, %arg1: i32) -> (i32, i32, i32) {
    %c0_i32 = arith.constant 0 : i32
    %c0_i32_0 = arith.constant 0 : i32
    %c0_i32_1 = arith.constant 0 : i32
    return %arg0, %c0_i32, %c0_i32_0 : i32, i32, i32
  }
  func.func @transform_1(%arg0: i32, %arg1: i32) -> (i32, i32) {
    %c0_i32 = arith.constant 0 : i32
    %c0_i32_0 = arith.constant 0 : i32
    %c0_i32_1 = arith.constant 0 : i32
    return %c0_i32, %c0_i32_0 : i32, i32
  }
  func.func @transform_2(%arg0: i32, %arg1: i32) -> (i32, i32) {
    %c0_i32 = arith.constant 0 : i32
    %c0_i32_0 = arith.constant 0 : i32
    %c0_i32_1 = arith.constant 0 : i32
    return %c0_i32, %c0_i32_0 : i32, i32
  }
  func.func @transform_3(%arg0: i32, %arg1: i32) -> (i32, i32) {
    %c0_i32 = arith.constant 0 : i32
    %c0_i32_0 = arith.constant 0 : i32
    %c0_i32_1 = arith.constant 0 : i32
    return %c0_i32, %c0_i32_0 : i32, i32
  }
  func.func @transform_4(%arg0: i32, %arg1: i32) -> (i32, i32) {
    %c0_i32 = arith.constant 0 : i32
    %c0_i32_0 = arith.constant 0 : i32
    %c0_i32_1 = arith.constant 0 : i32
    return %c0_i32, %c0_i32_0 : i32, i32
  }
  func.func @transform_5(%arg0: i32, %arg1: i32) -> (i32, i32) {
    %c0_i32 = arith.constant 0 : i32
    %c0_i32_0 = arith.constant 0 : i32
    %c0_i32_1 = arith.constant 0 : i32
    return %c0_i32, %c0_i32_0 : i32, i32
  }
  func.func @transform_6(%arg0: i32, %arg1: i32) -> (i32, i32, i32) {
    %c0_i32 = arith.constant 0 : i32
    %c0_i32_0 = arith.constant 0 : i32
    return %arg0, %arg1, %c0_i32 : i32, i32, i32
  }
}

</mosaic_0001>

<bundles_post_ra>
// kernel: tpu_custom_call.1
= control target key start
LH: loop header
LB: loop body
LE: loop exit
PB: predicated region body
PF: predicated region fallthrough
CT: control target
= control target key end

     0   :  { %s4367_s0 = inlined_call_operand.hbm [shape: bf16[2,64,64], index: 0, kind: input, shape index: {}]   ;;  %s4368_s1 = inlined_call_operand.hbm [shape: bf16[64,64], index: 1, kind: input, shape index: {}]   ;;  %s4369_s2 = inlined_call_operand.hbm [shape: bf16[64,64], index: 2, kind: input, shape index: {}]   ;;  %s4370_s3 = inlined_call_operand.hbm [shape: bf16[64,64], index: 3, kind: input, shape index: {}]   ;;  %s4371_s4 = inlined_call_operand.hbm [shape: bf16[64,64], index: 4, kind: input, shape index: {}]   ;;  %s4372_s5 = inlined_call_operand.vmem [shape: f32[1,64], index: 5, kind: input, shape index: {}]   ;;  %s4373_s6 = inlined_call_operand.hbm [shape: f32[2,64,64], index: 6, kind: output, shape index: {}]  }
   0x1   :  { %4381 = sst [smem:[#allocation20_spill]] %s4373_s6 }
   0x2   :  { %11 = vsyncpa [#allocation5], 0 }
   0x3   :  { %13 = vsyncpa [#allocation5 + $0x1], 0 }
   0x4   :  { %14 = vsyncpa [#allocation8], 0 }
   0x5   :  { %15 = vsyncpa [#allocation11], 0 }
   0x6   :  { %16 = vsyncpa [#allocation6], 0 }
   0x7   :  { %18 = vsyncpa [#allocation6 + $0x1], 0  ;;  %s3486_s21 = smov 0   ;;  %s3488_s22 = smov 0  }
   0x8   :  { %s3490_s23 = smov 0   ;;  %s3492_s24 = smov 0  }
   0x9   :  { %s3494_s25 = smov 0   ;;  %s3496_s26 = smov 0  }
   0xa LB: > { %4382 = sst [smem:[#allocation18_spill]] %s3416_s21  ;;  %s2458_s27 = sadd.s32 4294967295, %s3436_s26   ;;  %s3436_s26 = sphi %s3496_s26, %s24_s26   ;;  %s3432_s25 = sphi %s3494_s25, %s4406_s25   ;;  %s3428_s24 = sphi %s3492_s24, %s4405_s24   ;;  %s3424_s23 = sphi %s3490_s23, %s4404_s23   ;;  %s3420_s22 = sphi %s3488_s22, %s4403_s22   ;;  %s3416_s21 = sphi %s3486_s21, %s4402_s21  }
   0xb   : > { %s2459_s28 = sadd.s32 4294967294, %s3436_s26   ;;  %p56_p0 = scmp.ne.s32.totalorder %s3420_s22, %s3416_s21 }
   0xc   : > { %p3520_p1 = scmp.eq.s32.totalorder %s2458_s27, 0  ;;  %p3524_p2 = scmp.eq.s32.totalorder %s2458_s27, 1 }
   0xd   : > { %p193_p3 = scmp.eq.s32.totalorder %s2459_s28, 1  ;;  %p2460_p5 = scmp.ge.s32.totalorder %s3436_s26, 1 }
   0xe   : > { %s4383_s29 = scalar_select %p3520_p1, 1, 0 }
   0xf   : > { %s4384_s30 = scalar_select %p3524_p2, 1, 0 }
  0x10   : > { %p3530_p4 = por %p3520_p1, %p56_p0  ;;  %p3535_p6 = por %p193_p3, %p56_p0 }
  0x11   : > { %p200_p7 = scmp.lt.s32.totalorder %s3436_s26, 3  ;;  %s3438_s10 = smov [#allocation7]  }
  0x12   : > { %s4385_s7 = scalar_select %p3530_p4, 1, 0 }
  0x13   : > { %s4386_s8 = scalar_select %p3535_p6, 1, 0 }
  0x14   : > { %p3540_p8 = pnand %p2460_p5, %p200_p7  ;;  %s212_s11 = sshll.u32 %s3438_s10, 4  ;;  %s3544_s11 = int_to_ptr.vmem [resolvable:$true] %s212_s11 }
  0x15   : > { %4387 = sst [smem:[#allocation19_spill]] %s4386_s8  ;;  %s3439_s13 = smov [#allocation10]  }
  0x16   : > { %s4388_s9 = scalar_select %p3540_p8, 1, 0 }
  0x17   : > { %p2960_p9 = pneg %p3540_p8  ;;  %s238_s14 = sshll.u32 %s3439_s13, 4  ;;  %s3555_s14 = int_to_ptr.vmem [resolvable:$true] %s238_s14 }
  0x18   : > { %s3440_s15 = smov [#allocation9]   ;;  %s3204_s19 = scalar_lea.hbm %s4368_s1, 512 }
  0x19   : > { %p3551_p11 = pnand %p2960_p9, %p3520_p1  ;;  %s3557_s16 = sshll.u32 %s3440_s15, 4  ;;  %s226_s16 = int_to_ptr.vmem [resolvable:$true] %s3557_s16 }
  0x1a   : > { %p3205_p12 = scmp.ne.s32.totalorder %s4368_s1, %s3204_s19  ;;  %p3211_p5 = scmp.lt.u32.totalorder %s3204_s19, %s4368_s1 }
  0x1b   : > { %p3567_p13 = pneg %p3551_p11 }
  0x1d   : > { %p3207_p0 = pnand %p3567_p13, %p3205_p12 }
  0x1f   : > { %p3208_p3 = pneg %p3207_p0 }
  0x21   : > { %p3213_p7 = pnand %p3211_p5, %p3208_p3 }
  0x23   : > { %3216 = shalt.err (!%p3213_p7)
}
  0x24   : > { %s3217_s15 = scalar_lea.vmem %s3544_s11, 512  ;;  %p3225_p1 = scmp.lt.s32.totalorder %s3544_s11, %s3544_s11 }
  0x25   : > { %p3218_p9 = scmp.ne.s32.totalorder %s3544_s11, %s3217_s15  ;;  %p3226_p4 = scmp.lt.s32.totalorder %s3217_s15, %s3217_s15 }
  0x27   : > { %p3220_p10 = pnand %p3218_p9, %p3567_p13  ;;  %p3227_p12 = por %p3226_p4, %p3225_p1 }
  0x29   : > { %p3221_p6 = pneg %p3220_p10 }
  0x2b   : > { %p3228_p0 = pnand %p3227_p12, %p3221_p6 }
  0x2d   : > { %3231 = shalt.err (!%p3228_p0)
}
  0x2e   : > { %s3441_s17 = smov 64   ;;  %s3442_s18 = smov 4  }
  0x2f   : > { %2963 = dma.hbm_to_vmem [thread:$0]  (!%p3551_p11), %s4368_s1, 512, %s3544_s11, [#allocation8], %s3441_s17, %s3441_s17, %s3442_s18  }
  0x30   : > { %s3232_s13 = scalar_lea.hbm %s4370_s3, 512 }
  0x31   : > { %p3233_p1 = scmp.ne.s32.totalorder %s4370_s3, %s3232_s13  ;;  %p3239_p10 = scmp.lt.u32.totalorder %s3232_s13, %s4370_s3 }
  0x33   : > { %p3235_p4 = pnand %p3233_p1, %p3567_p13 }
  0x35   : > { %p3236_p6 = pneg %p3235_p4 }
  0x37   : > { %p3241_p3 = pnand %p3239_p10, %p3236_p6 }
  0x39   : > { %3244 = shalt.err (!%p3241_p3)
}
  0x3a   : > { %s3245_s11 = scalar_lea.vmem %s3555_s14, 512  ;;  %p3253_p12 = scmp.lt.s32.totalorder %s3555_s14, %s3555_s14 }
  0x3b   : > { %p3246_p5 = scmp.ne.s32.totalorder %s3555_s14, %s3245_s11  ;;  %p3254_p0 = scmp.lt.s32.totalorder %s3245_s11, %s3245_s11 }
  0x3d   : > { %p3248_p7 = pnand %p3246_p5, %p3567_p13  ;;  %p3255_p1 = por %p3254_p0, %p3253_p12 }
  0x3f   : > { %p3249_p9 = pneg %p3248_p7 }
  0x41   : > { %p3256_p4 = pnand %p3255_p1, %p3249_p9 }
  0x43   : > { %3259 = shalt.err (!%p3256_p4)
}
  0x44   : > { %2969 = dma.hbm_to_vmem [thread:$0]  (!%p3551_p11), %s4370_s3, 512, %s3555_s14, [#allocation11], %s3441_s17, %s3441_s17, %s3442_s18  }
  0x45   : > { %s3260_s20 = scalar_lea.hbm %s4369_s2, 512 }
  0x46   : > { %p3261_p6 = scmp.ne.s32.totalorder %s4369_s2, %s3260_s20  ;;  %p3267_p5 = scmp.lt.u32.totalorder %s3260_s20, %s4369_s2 }
  0x48   : > { %p3263_p10 = pnand %p3261_p6, %p3567_p13 }
  0x4a   : > { %p3264_p3 = pneg %p3263_p10 }
  0x4c   : > { %p3269_p7 = pnand %p3267_p5, %p3264_p3 }
  0x4e   : > { %3272 = shalt.err (!%p3269_p7)
}
  0x4f   : > { %s3273_s11 = scalar_lea.vmem %s226_s16, 512  ;;  %p3281_p1 = scmp.lt.s32.totalorder %s226_s16, %s226_s16 }
  0x50   : > { %p3274_p9 = scmp.ne.s32.totalorder %s226_s16, %s3273_s11  ;;  %p3282_p4 = scmp.lt.s32.totalorder %s3273_s11, %s3273_s11 }
  0x52   : > { %p3276_p12 = pnand %p3274_p9, %p3567_p13  ;;  %p3283_p8 = por %p3282_p4, %p3281_p1 }
  0x54   : > { %p3277_p0 = pneg %p3276_p12 }
  0x56   : > { %p3284_p2 = pnand %p3283_p8, %p3277_p0 }
  0x58   : > { %3287 = shalt.err (!%p3284_p2)
}
  0x59   : > { %2966 = dma.hbm_to_vmem [thread:$0]  (!%p3551_p11), %s4369_s2, 512, %s226_s16, [#allocation8], %s3441_s17, %s3441_s17, %s3442_s18  }
  0x5a   : > { %s3443_s21 = smov [#allocation12]   ;;  %s3288_s27 = scalar_lea.hbm %s4371_s4, 512 }
  0x5b   : > { %s251_s8 = sshll.u32 %s3443_s21, 4  ;;  %p3289_p2 = scmp.ne.s32.totalorder %s4371_s4, %s3288_s27  ;;  %s252_s8 = int_to_ptr.vmem [resolvable:$true] %s251_s8 }
  0x5c   : > { %p3295_p10 = scmp.lt.u32.totalorder %s3288_s27, %s4371_s4 }
  0x5d   : > { %p3291_p8 = pnand %p3289_p2, %p3567_p13 }
  0x5f   : > { %p3292_p6 = pneg %p3291_p8 }
  0x61   : > { %p3297_p3 = pnand %p3295_p10, %p3292_p6 }
  0x63   : > { %3300 = shalt.err (!%p3297_p3)
}
  0x64   : > { %s3301_s16 = scalar_lea.vmem %s252_s8, 512  ;;  %p3309_p12 = scmp.lt.s32.totalorder %s252_s8, %s252_s8 }
  0x65   : > { %p3302_p5 = scmp.ne.s32.totalorder %s252_s8, %s3301_s16  ;;  %p3310_p0 = scmp.lt.s32.totalorder %s3301_s16, %s3301_s16 }
  0x67   : > { %p3304_p7 = pnand %p3302_p5, %p3567_p13  ;;  %p3311_p1 = por %p3310_p0, %p3309_p12 }
  0x69   : > { %p3305_p9 = pneg %p3304_p7 }
  0x6b   : > { %p3312_p4 = pnand %p3311_p1, %p3305_p9 }
  0x6d   : > { %3315 = shalt.err (!%p3312_p4)
}
  0x6e   : > { %2972 = dma.hbm_to_vmem [thread:$0]  (!%p3551_p11), %s4371_s4, 512, %s252_s8, [#allocation11], %s3441_s17, %s3441_s17, %s3442_s18  }
  0x6f   : > { %s36_s28 = sadd.s32 1, %s3432_s25  ;;  %s43_s12 = sadd.s32 1, %s3424_s23 }
  0x70   : > { %p38_p13 = scmp.ge.s32.totalorder %s36_s28, 2  ;;  %p50_p2 = scmp.ne.s32.totalorder %s3424_s23, %s3420_s22 }
  0x71   : > { %p51_p8 = scmp.eq.s32.totalorder %s3436_s26, 0  ;;  %p2985_p6 = scmp.lt.s32.totalorder %s3436_s26, 2 }
  0x72   : > { %s4408_s28 = smov (%p38_p13, %s36_s28), 0  ;;  %p4391_p3 = scmp.ne.s32.totalorder %s4384_s30, 0 }
  0x73   : > { %p52_p10 = por %p51_p8, %p50_p2  ;;  %s40_s19 = ssub.s32 %s3432_s25, %s4408_s28 }
  0x74   : > { %p3670_p5 = por %p4391_p3, %p50_p2  ;;  %s268_s20 = sand.u32 1, %s3424_s23  }
  0x75   : > { %p41_p7 = scmp.eq.s32.totalorder %s40_s19, 0  ;;  %s2466_s8 = sshll.u32 %s268_s20, 5 }
  0x76   : > { %s2566_s27 = sshll.u32 %s3432_s25, 9  ;;  %s272_s30 = scalar_lea.vmem [#allocation4], %s2466_s8 }
  0x77   : > { %s3679_s10 = scalar_select %p41_p7, %s3424_s23, %s43_s12  }
  0x78   : > { %s3684_s11 = scalar_lea.hbm %s4367_s0, %s2566_s27  ;;  %s279_s16 = sshll.u32 %s272_s30, 4  ;;  %s3692_s16 = int_to_ptr.vmem [resolvable:$true] %s279_s16 }
  0x79   : > { %p3688_p11 = pnand %p2985_p6, %p52_p10  ;;  %s3694_s6 = scalar_lea.sflag [#allocation5], %s268_s20 }
  0x7a   : > { %s3316_s12 = scalar_lea.hbm %s3684_s11, 512  ;;  %s3321_s27 = scalar_lea.hbm %s4367_s0, 1024 }
  0x7b   : > { %p3317_p9 = scmp.ne.s32.totalorder %s3684_s11, %s3316_s12  ;;  %p3318_p12 = pneg %p3688_p11 }
  0x7c   : > { %p3322_p4 = scmp.lt.u32.totalorder %s3684_s11, %s4367_s0  ;;  %p3323_p13 = scmp.lt.u32.totalorder %s3321_s27, %s3316_s12 }
  0x7d   : > { %p3319_p0 = pnand %p3318_p12, %p3317_p9  ;;  %p3325_p8 = scmp.lt.u32.totalorder %s3316_s12, %s3684_s11 }
  0x7e   : > { %p3324_p2 = por %p3323_p13, %p3322_p4 }
  0x7f   : > { %p3320_p1 = pneg %p3319_p0 }
  0x80   : > { %p3326_p6 = por %p3325_p8, %p3324_p2 }
  0x82   : > { %p3327_p10 = pnand %p3326_p6, %p3320_p1 }
  0x84   : > { %3330 = shalt.err (!%p3327_p10)
}
  0x85   : > { %s3331_s20 = scalar_lea.vmem %s3692_s16, 512  ;;  %s3444_s30 = smov [#allocation4]  }
  0x86   : > { %p3332_p3 = scmp.ne.s32.totalorder %s3692_s16, %s3331_s20  ;;  %s3336_s19 = sshll.u32 %s3444_s30, 4  ;;  %s3337_s19 = int_to_ptr.vmem [resolvable:$false] %s3336_s19 }
  0x87   : > { %s3338_s8 = scalar_lea.vmem %s3337_s19, 1024  ;;  %p3339_p0 = scmp.lt.s32.totalorder %s3692_s16, %s3337_s19 }
  0x88   : > { %p3334_p7 = pnand %p3332_p3, %p3318_p12  ;;  %p3340_p4 = scmp.lt.s32.totalorder %s3338_s8, %s3331_s20 }
  0x8a   : > { %p3335_p9 = pneg %p3334_p7  ;;  %p3341_p13 = por %p3340_p4, %p3339_p0 }
  0x8c   : > { %p3342_p2 = pnand %p3341_p13, %p3335_p9 }
  0x8e   : > { %3345 = shalt.err (!%p3342_p2)
}
  0x8f   : > { %2976 = dma.hbm_to_vmem [thread:$0]  (!%p3688_p11), %s3684_s11, 512, %s3692_s16, %s3694_s6, %s3441_s17, %s3441_s17, %s3442_s18  }
  0x90   : > { %p4394_p12 = scmp.ne.s32.totalorder %s4388_s9, 0 }
  0x91   : > { %s3728_s12 = sand.u32 (!%p4394_p12), 1, %s3420_s22   ;;  %p4395_p1 = scmp.ne.s32.totalorder (!%p4394_p12), %s4385_s7, 0 }
  0x92   : > { %291 = sbr.rel (%p4394_p12) target bundleno = 2248 (0x8c8), region = 44  ;;  %s2470_s27 = sshll.u32 (!%p4394_p12), %s3728_s12, 5 }
  0x93   : > { %s294_s13 = scalar_lea.sflag (!%p4394_p12), [#allocation5], %s3728_s12  ;;  %s3732_s15 = scalar_lea.vmem (!%p4394_p12), [#allocation4], %s2470_s27 }
  0x99   : > { %3399 = dma.done.wait (%p4395_p1), %s294_s13, 512  }
  0x9a   : > { %3401 = vsyncadd (%p4395_p1), %s294_s13, 4294966784  ;;  %p4396_p11 = scmp.ne.s32.totalorder %s4383_s29, 0 }
  0x9c   : > { %3403 = dma.done.wait (%p4396_p11), [#allocation8], 1024  }
  0x9d   : > { %3405 = vsyncadd (%p4396_p11), [#allocation8], 4294966272 }
  0x9e   : > { %3407 = dma.done.wait (%p4396_p11), [#allocation11], 1024  }
  0x9f   : > { %3409 = vsyncadd (%p4396_p11), [#allocation11], 4294966272  ;;  %v3050_v0 = vld [vmem:[#allocation9] sm:$0xff]   ;;  %v3051_v1 = vld [vmem:[#allocation9 + $0x8] sm:$0xff]   ;;  %vm416_vm0 = vcmask 523264   ;;  %vm754_vm1 = vcmask 130048  }
  0xa0   : > { %2676 = vmatprep.subr.bf16.mxu0 %v3050_v0  ;;  %v3052_v2 = vld [vmem:[#allocation9 + $0x10] sm:$0xff]   ;;  %v3054_v3 = vld [vmem:[%s3732_s15] sm:$0xff]   ;;  %v3053_v4 = vld [vmem:[#allocation9 + $0x18] sm:$0xff]   ;;  %s3445_s29 = smov 112   ;;  %s3446_s7 = smov 96  }
  0xa1   : > { %2677 = vmatpush3.bf16.msra.mxu0 %v3050_v0  ;;  %2684 = vmatprep.mubr.msk.bf16.mxu0 %vm416_vm0, %v3054_v3  ;;  %v3058_v5 = vld [vmem:[#allocation7] sm:$0xff]   ;;  %v3055_v6 = vld [vmem:[%s3732_s15 + $0x8] sm:$0xff]   ;;  %v3056_v7 = vld [vmem:[%s3732_s15 + $0x10] sm:$0xff]   ;;  %s3447_s9 = smov 80   ;;  %s2475_s17 = sshll.u32 %s3728_s12, 6 }
  0xa2   : > { %2678 = vmatprep.subr.bf16.mxu0 %v3051_v1  ;;  %2700 = vmatprep.mubr.msk.bf16.mxu1 %vm416_vm0, %v3054_v3  ;;  %v3059_v8 = vld [vmem:[#allocation7 + $0x8] sm:$0xff]   ;;  %v3066_v9 = vld [vmem:[#allocation10] sm:$0xff]   ;;  %v3060_v11 = vld [vmem:[#allocation7 + $0x10] sm:$0xff]   ;;  %s341_s16 = scalar_lea.vmem [#allocation13], %s2475_s17  ;;  %s2567_s14 = sshll.u32 %s3428_s24, 10 }
  0xa3   : > { %v3067_v10 = vld [vmem:[#allocation10 + $0x8] sm:$0xff]   ;;  %2692 = vmatprep.subr.bf16.mxu1 %v3066_v9  ;;  %v3068_v12 = vld [vmem:[#allocation10 + $0x10] sm:$0xff]   ;;  %v3057_v13 = vld [vmem:[%s3732_s15 + $0x18] sm:$0xff]   ;;  %s2334_s6 = sshll.u32 %s341_s16, 4  ;;  %s4397_s19 = sld [smem:[#allocation20_spill]]  ;;  %s4315_s6 = int_to_ptr.vmem [resolvable:$true] %s2334_s6 }
  0xa4   : > { %2693 = vmatpush3.bf16.msra.mxu1 %v3066_v9  ;;  %v3062_v14 = vld [vmem:[%s3732_s15] sm:$0xff]   ;;  %v3061_v15 = vld [vmem:[#allocation7 + $0x18] sm:$0xff]   ;;  %v3063_v16 = vld [vmem:[%s3732_s15 + $0x8] sm:$0xff]   ;;  %s2319_s24 = scalar_lea.sflag [#allocation6], %s3728_s12  ;;  %s3346_s27 = scalar_lea.vmem %s4315_s6, 1024 }
  0xa5   : > { %2679 = vmatpush3.bf16.msra.mxu0 %v3051_v1  ;;  %2694 = vmatprep.subr.bf16.mxu1 %v3067_v10  ;;  %v3064_v17 = vld [vmem:[%s3732_s15 + $0x10] sm:$0xff]   ;;  %v3065_v18 = vld [vmem:[%s3732_s15 + $0x18] sm:$0xff]   ;;  %p3347_p8 = scmp.ne.s32.totalorder %s4315_s6, %s3346_s27  ;;  %s3448_s13 = smov [#allocation13]  }
  0xa6   : > { %2680 = vmatprep.subr.bf16.mxu0 %v3052_v2  ;;  %v3069_v19 = vld [vmem:[#allocation10 + $0x18] sm:$0xff]   ;;  %s3350_s15 = sshll.u32 %s3448_s13, 4  ;;  %s3351_s15 = int_to_ptr.vmem [resolvable:$false] %s3350_s15 }
  0xa7   : > { %p3348_p6 = pnand %p3347_p8, %p3670_p5  ;;  %p3353_p3 = scmp.lt.s32.totalorder %s4315_s6, %s3351_s15 }
  0xa8   : > { %2695 = vmatpush3.bf16.msra.mxu1 %v3067_v10 }
  0xa9   : > { %2681 = vmatpush3.bf16.msra.mxu0 %v3052_v2  ;;  %2696 = vmatprep.subr.bf16.mxu1 %v3068_v12  ;;  %s4313_s8 = scalar_lea.hbm %s4397_s19, %s2567_s14  ;;  %p3349_p10 = pneg %p3348_p6 }
  0xaa   : > { %2682 = vmatprep.subr.bf16.mxu0 %v3053_v4 }
  0xac   : > { %2697 = vmatpush3.bf16.msra.mxu1 %v3068_v12 }
  0xad   : > { %2683 = vmatpush3.bf16.msra.mxu0 %v3053_v4  ;;  %2698 = vmatprep.subr.bf16.mxu1 %v3069_v19 }
  0xae   : > { %2708 = vmatprep.subr.bf16.mxu0 %v3058_v5 }
  0xb0   : > { %2685 = vmatmul.mubr.msk.bf16.vlgmr.msra.gmra.mrb[0].mxu0 %vm416_vm0, %v3055_v6  ;;  %2699 = vmatpush3.bf16.msra.mxu1 %v3069_v19 }
  0xb1   : > { %2688 = vmatprep.mubr.msk.bf16.mxu0 %vm416_vm0, %v3056_v7  ;;  %2709 = vmatpush3.bf16.msra.mxu0 %v3058_v5 }
  0xb2   : > { %2710 = vmatprep.subr.bf16.mxu0 %v3059_v8 }
  0xb3   : > { %2701 = vmatmul.mubr.msk.bf16.vlgmr.msra.gmra.mrb[0].mxu1 %vm416_vm0, %v3055_v6 }
  0xb4   : > { %2704 = vmatprep.mubr.msk.bf16.mxu1 %vm416_vm0, %v3056_v7 }
  0xb5   : > { %2711 = vmatpush3.bf16.msra.mxu0 %v3059_v8 }
  0xb6   : > { %2712 = vmatprep.subr.bf16.mxu0 %v3060_v11 }
  0xb8   : > { %2689 = vmatmul.mubr.msk.bf16.gmra.mrb[4].mxu0 %vm416_vm0, %v3057_v13 }
  0xb9   : > { %2713 = vmatpush3.bf16.msra.mxu0 %v3060_v11  ;;  %2716 = vmatprep.mubr.msk.bf16.mxu0 %vm416_vm0, %v3062_v14 }
  0xba   : > { %2714 = vmatprep.subr.bf16.mxu0 %v3061_v15 }
  0xbb   : > { %2705 = vmatmul.mubr.msk.bf16.gmra.mrb[4].mxu1 %vm416_vm0, %v3057_v13 }
  0xbd   : > { %2715 = vmatpush3.bf16.msra.mxu0 %v3061_v15 }
  0xc0   : > { %2717 = vmatmul.mubr.msk.bf16.vlgmr.msra.gmra.mrb[8].mxu0 %vm416_vm0, %v3063_v16 }
  0xc1   : > { %2720 = vmatprep.mubr.msk.bf16.mxu0 %vm416_vm0, %v3064_v17 }
  0xc8   : > { %2721 = vmatmul.mubr.msk.bf16.gmra.mrb[12].mxu0 %vm416_vm0, %v3065_v18 }
 0x183   : > { %v2686_v20 = vpop.f32.mrb[0].mxu0 }
 0x184   : > { %v463_v21 = vpop.f32.mrb[1].mxu0 }
 0x185   : > { %v2687_v22 = vpop.f32.mrb[2].mxu0 }
 0x186   : > { %v495_v23 = vpack.c.bf16 %v2687_v22, %v2686_v20  ;;  %v466_v24 = vpop.f32.mrb[3].mxu0  ;;  %v2702_v52 = vpop.f32.mrb[0].mxu1 }
 0x187   : > { %v494_v25 = vpack.c.bf16 %v466_v24, %v463_v21  ;;  %v560_v53 = vpop.f32.mrb[1].mxu1 }
 0x188   : > { %499 = vst.msk [vmem:[#allocation2 + $0x8] sm:$0xff] %vm416_vm0, %v495_v23  ;;  %v2703_v54 = vpop.f32.mrb[2].mxu1 }
 0x189   : > { %498 = vst.msk [vmem:[#allocation2] sm:$0xff] %vm416_vm0, %v494_v25  ;;  %v592_v55 = vpack.c.bf16 %v2703_v54, %v2702_v52  ;;  %v563_v56 = vpop.f32.mrb[3].mxu1 }
 0x18a   : > { %v591_v57 = vpack.c.bf16 %v563_v56, %v560_v53 }
 0x18b   : > { %v2690_v26 = vpop.f32.mrb[4].mxu0  ;;  %596 = vst.msk [vmem:[#allocation3 + $0x8] sm:$0xff] %vm416_vm0, %v592_v55 }
 0x18c   : > { %v479_v27 = vpop.f32.mrb[5].mxu0  ;;  %595 = vst.msk [vmem:[#allocation3] sm:$0xff] %vm416_vm0, %v591_v57 }
 0x18d   : > { %v2691_v28 = vpop.f32.mrb[6].mxu0 }
 0x18e   : > { %v497_v29 = vpack.c.bf16 %v2691_v28, %v2690_v26  ;;  %v482_v30 = vpop.f32.mrb[7].mxu0  ;;  %v2706_v58 = vpop.f32.mrb[4].mxu1 }
 0x18f   : > { %v496_v31 = vpack.c.bf16 %v482_v30, %v479_v27  ;;  %v3776_v34 = vld [vmem:[#allocation2 + $0x8] sm:$0xff]  ;;  %v576_v59 = vpop.f32.mrb[5].mxu1 }
 0x190   : > { %v3768_v32 = vld [vmem:[#allocation2] sm:$0xff]  ;;  %501 = vst.msk [vmem:[#allocation2 + $0x18] sm:$0xff] %vm416_vm0, %v497_v29  ;;  %v771_v42 = vsel %vm754_vm1, %v3776_v34, 0  ;;  %v2707_v60 = vpop.f32.mrb[6].mxu1 }
 0x191   : > { %2924 = vmatprep.subr.msk.bf16.mxu1 %vm754_vm1, %v3768_v32  ;;  %v768_v33 = vsel %vm754_vm1, %v3768_v32, 0  ;;  %500 = vst.msk [vmem:[#allocation2 + $0x10] sm:$0xff] %vm416_vm0, %v496_v31  ;;  %v594_v61 = vpack.c.bf16 %v2707_v60, %v2706_v58  ;;  %v579_v62 = vpop.f32.mrb[7].mxu1 }
 0x192   : > { %2725 = vmatpush3.bf16.xpose.msra.mxu1 %v768_v33  ;;  %v593_v63 = vpack.c.bf16 %v579_v62, %v576_v59  ;;  %v3814_v1 = vld [vmem:[#allocation3 + $0x8] sm:$0xff] }
 0x193   : > { %2925 = vmatprep.subr.msk.bf16.mxu1 %vm754_vm1, %v3776_v34  ;;  %v2718_v35 = vpop.f32.mrb[8].mxu0  ;;  %v3812_v0 = vld [vmem:[#allocation3] sm:$0xff]  ;;  %598 = vst.msk [vmem:[#allocation3 + $0x18] sm:$0xff] %vm416_vm0, %v594_v61 }
 0x194   : > { %v711_v36 = vpop.f32.mrb[9].mxu0  ;;  %2740 = vmatprep.subr.bf16.mxu0 %v3812_v0  ;;  %597 = vst.msk [vmem:[#allocation3 + $0x10] sm:$0xff] %vm416_vm0, %v593_v63 }
 0x195   : > { %v2719_v37 = vpop.f32.mrb[10].mxu0  ;;  %2741 = vmatpush3.bf16.msra.mxu0 %v3812_v0 }
 0x196   : > { %v3780_v38 = vpack.c.bf16 %v2719_v37, %v2718_v35  ;;  %v714_v39 = vpop.f32.mrb[11].mxu0  ;;  %2742 = vmatprep.subr.bf16.mxu0 %v3814_v1 }
 0x197   : > { %v3782_v40 = vpack.c.bf16 %v714_v39, %v711_v36  ;;  %v3798_v50 = vld [vmem:[#allocation2 + $0x18] sm:$0xff] }
 0x198   : > { %v3784_v41 = vld [vmem:[#allocation2 + $0x10] sm:$0xff]  ;;  %v777_v51 = vsel %vm754_vm1, %v3798_v50, 0 }
 0x199   : > { %2732 = vmatprep.mubr.msk.bf16.mxu1 %vm754_vm1, %v3782_v40  ;;  %v774_v49 = vsel %vm754_vm1, %v3784_v41, 0  ;;  %2743 = vmatpush3.bf16.msra.mxu0 %v3814_v1 }
 0x19a   : > { %2727 = vmatpush3.bf16.xpose.msra.mxu1 %v771_v42  ;;  %v3826_v3 = vld [vmem:[#allocation3 + $0x18] sm:$0xff] }
 0x19b   : > { %2926 = vmatprep.subr.msk.bf16.mxu1 %vm754_vm1, %v3784_v41  ;;  %v2722_v43 = vpop.f32.mrb[12].mxu0  ;;  %v3822_v2 = vld [vmem:[#allocation3 + $0x10] sm:$0xff] }
 0x19c   : > { %v727_v44 = vpop.f32.mrb[13].mxu0  ;;  %2744 = vmatprep.subr.bf16.mxu0 %v3822_v2 }
 0x19d   : > { %v2723_v45 = vpop.f32.mrb[14].mxu0  ;;  %2745 = vmatpush3.bf16.msra.mxu0 %v3822_v2 }
 0x19e   : > { %v3792_v46 = vpack.c.bf16 %v2723_v45, %v2722_v43  ;;  %v730_v47 = vpop.f32.mrb[15].mxu0  ;;  %2746 = vmatprep.subr.bf16.mxu0 %v3826_v3 }
 0x19f   : > { %v3794_v48 = vpack.c.bf16 %v730_v47, %v727_v44 }
 0x1a1   : > { %2747 = vmatpush3.bf16.msra.mxu0 %v3826_v3 }
 0x1a2   : > { %2729 = vmatpush3.bf16.xpose.msra.mxu1 %v774_v49 }
 0x1a3   : > { %2927 = vmatprep.subr.msk.bf16.mxu1 %vm754_vm1, %v3798_v50 }
 0x1aa   : > { %2731 = vmatpush3.bf16.xpose.msra.mxu1 %v777_v51 }
 0x1b1   : > { %2733 = vmatmul.mubr.msk.bf16.vlgmr.msra.gmra.mrb[8].mxu1 %vm754_vm1, %v3780_v38 }
 0x1b2   : > { %2736 = vmatprep.mubr.msk.bf16.mxu1 %vm754_vm1, %v3794_v48 }
 0x1b9   : > { %2737 = vmatmul.mubr.msk.bf16.gmra.mrb[12].mxu1 %vm754_vm1, %v3792_v46 }
 0x284   : > { %v2734_v4 = vpop.f32.mrb[8].mxu1 }
 0x285   : > { %v813_v5 = vpop.f32.mrb[9].mxu1  ;;  %v850_v6 = vsel %vm416_vm0, %v2734_v4, -inf }
 0x286   : > { %851 = vmax.xlane.f32.xlu1 %v850_v6  ;;  %v2735_v7 = vpop.f32.mrb[10].mxu1  ;;  %v844_v8 = vsel %vm416_vm0, %v813_v5, -inf }
 0x287   : > { %845 = vmax.xlane.f32.xlu0 %v844_v8  ;;  %v816_v9 = vpop.f32.mrb[11].mxu1  ;;  %v853_v10 = vsel %vm416_vm0, %v2735_v7, -inf }
 0x288   : > { %v847_v11 = vsel %vm416_vm0, %v816_v9, -inf }
 0x28a   : > { %854 = vmax.xlane.f32.xlu1 %v853_v10 }
 0x28b   : > { %848 = vmax.xlane.f32.xlu0 %v847_v11 }
 0x28c   : > { %v3834_v12 = vpop.f32.mrb[12].mxu1 }
 0x28d   : > { %v862_v13 = vsel %vm416_vm0, %v3834_v12, -inf  ;;  %v3838_v14 = vpop.f32.mrb[13].mxu1 }
 0x28e   : > { %v3840_v15 = vpop.f32.mrb[14].mxu1  ;;  %v856_v17 = vsel %vm416_vm0, %v3838_v14, -inf }
 0x28f   : > { %863 = vmax.xlane.f32.xlu0 %v862_v13  ;;  %v3842_v16 = vpop.f32.mrb[15].mxu1  ;;  %v865_v18 = vsel %vm416_vm0, %v3840_v15, -inf }
 0x290   : > { %v859_v19 = vsel %vm416_vm0, %v3842_v16, -inf }
 0x293   : > { %857 = vmax.xlane.f32.xlu0 %v856_v17 }
 0x29b   : > { %1045 = vrot.lane.b32.xlu1 %v3776_v34, %s3445_s29 }
 0x29f   : > { %1047 = vrot.lane.b32.xlu1 %v3784_v41, %s3445_s29 }
 0x2a9   : > { %1043 = vrot.lane.b32.xlu0 %v3768_v32, %s3445_s29 }
 0x2ad   : > { %1031 = vrot.lane.b32.xlu0 %v3782_v40, %s3445_s29 }
 0x2b1   : > { %1035 = vrot.lane.b32.xlu0 %v3794_v48, %s3445_s29 }
 0x2b5   : > { %1517 = vrot.lane.b32.xlu0 %v3768_v32, %s3446_s7 }
 0x2b9   : > { %1521 = vrot.lane.b32.xlu0 %v3784_v41, %s3446_s7 }
 0x2bd   : > { %1505 = vrot.lane.b32.xlu0 %v3782_v40, %s3446_s7 }
 0x2c1   : > { %1509 = vrot.lane.b32.xlu0 %v3794_v48, %s3446_s7 }
 0x2c3   : > { %866 = vmax.xlane.f32.xlu1 %v865_v18 }
 0x2c7   : > { %860 = vmax.xlane.f32.xlu1 %v859_v19 }
 0x2d8   : > { %1049 = vrot.lane.b32.xlu1 %v3798_v50, %s3445_s29 }
 0x2dc   : > { %1033 = vrot.lane.b32.xlu1 %v3780_v38, %s3445_s29 }
 0x2e0   : > { %1037 = vrot.lane.b32.xlu1 %v3792_v46, %s3445_s29 }
 0x2e4   : > { %1519 = vrot.lane.b32.xlu1 %v3776_v34, %s3446_s7 }
 0x2e8   : > { %1523 = vrot.lane.b32.xlu1 %v3798_v50, %s3446_s7 }
 0x2ec   : > { %1507 = vrot.lane.b32.xlu1 %v3780_v38, %s3446_s7 }
 0x2f0   : > { %1511 = vrot.lane.b32.xlu1 %v3792_v46, %s3446_s7 }
 0x313   : > { %v852_v20 = vpop.xlane.xlu1 %851 }
 0x314   : > { %v870_v21 = vsub.f32 %v2734_v4, %v852_v20  ;;  %v846_v22 = vpop.xlane.xlu0 %845 }
 0x315   : > { %v868_v23 = vsub.f32 %v813_v5, %v846_v22 }
 0x316   : > { %v880_v24 = vmul.f32 1.442695, %v870_v21 }
 0x317   : > { %v876_v25 = vmul.f32 1.442695, %v868_v23  ;;  %v855_v26 = vpop.xlane.xlu1 %854 }
 0x318   : > { %v871_v27 = vsub.f32 %v2735_v7, %v855_v26  ;;  %v849_v28 = vpop.xlane.xlu0 %848  ;;  %3074 = vpow2.f32 %v880_v24 }
 0x319   : > { %v869_v29 = vsub.f32 %v816_v9, %v849_v28  ;;  %3076 = vpow2.f32 %v876_v25 }
 0x31a   : > { %v882_v30 = vmul.f32 1.442695, %v871_v27 }
 0x31b   : > { %v878_v31 = vmul.f32 1.442695, %v869_v29  ;;  %v1046_v49 = vpop.permute.xlu1 %1045 }
 0x31c   : > { %3078 = vpow2.f32 %v882_v30  ;;  %v864_v33 = vpop.xlane.xlu0 %863  ;;  %v1067_v51 = vsel %vm754_vm1, %v1046_v49, 0 }
 0x31d   : > { %3080 = vpow2.f32 %v878_v31  ;;  %v874_v54 = vsub.f32 %v3834_v12, %v864_v33 }
 0x31f   : > { %v1048_v52 = vpop.permute.xlu1 %1047  ;;  %v888_v56 = vmul.f32 1.442695, %v874_v54 }
 0x320   : > { %v858_v35 = vpop.xlane.xlu0 %857  ;;  %v1070_v53 = vsel %vm754_vm1, %v1048_v52, 0 }
 0x321   : > { %v872_v57 = vsub.f32 %v3838_v14, %v858_v35  ;;  %3082 = vpow2.f32 %v888_v56 }
 0x322   : > { %v3882_v36 = vpop.eup %3074 }
 0x323   : > { %v3884_v39 = vpop.eup %3076  ;;  %v884_v61 = vmul.f32 1.442695, %v872_v57 }
 0x324   : > { %v1044_v37 = vpop.permute.xlu0 %1043 }
 0x325   : > { %2928 = vmatprep.subr.msk.bf16.mxu0 %vm754_vm1, %v1044_v37  ;;  %v1064_v47 = vsel %vm754_vm1, %v1044_v37, 0 }
 0x326   : > { %v3887_v42 = vpop.eup %3078 }
 0x327   : > { %v3889_v43 = vpop.eup %3080  ;;  %v917_v44 = vpack.c.bf16 %v3887_v42, %v3882_v36 }
 0x328   : > { %v916_v45 = vpack.c.bf16 %v3889_v43, %v3884_v39  ;;  %v1032_v55 = vpop.permute.xlu0 %1031 }
 0x32a   : > { %2748 = vmatprep.mubr.msk.bf16.mxu0 %vm416_vm0, %v916_v45 }
 0x32b   : > { %2749 = vmatmul.mubr.msk.bf16.vlgmr.msra.gmra.mrb[16].mxu0 %vm416_vm0, %v917_v44  ;;  %v3909_v9 = vpop.eup %3082 }
 0x32c   : > { %2757 = vmatpush3.bf16.xpose.msra.mxu0 %v1064_v47  ;;  %v1036_v62 = vpop.permute.xlu0 %1035 }
 0x32d   : > { %2929 = vmatprep.subr.msk.bf16.mxu0 %vm754_vm1, %v1046_v49 }
 0x330   : > { %v1518_v8 = vpop.permute.xlu0 %1517 }
 0x331   : > { %v1538_v17 = vsel %vm754_vm1, %v1518_v8, 0 }
 0x334   : > { %2759 = vmatpush3.bf16.xpose.msra.mxu0 %v1067_v51  ;;  %v1522_v19 = vpop.permute.xlu0 %1521 }
 0x335   : > { %2930 = vmatprep.subr.msk.bf16.mxu0 %vm754_vm1, %v1048_v52  ;;  %v1544_v22 = vsel %vm754_vm1, %v1522_v19, 0 }
 0x338   : > { %v1506_v20 = vpop.permute.xlu0 %1505 }
 0x33c   : > { %2761 = vmatpush3.bf16.xpose.msra.mxu0 %v1070_v53  ;;  %v1510_v26 = vpop.permute.xlu0 %1509 }
 0x350   : > { %v867_v58 = vpop.xlane.xlu1 %866 }
 0x351   : > { %v875_v59 = vsub.f32 %v3840_v15, %v867_v58 }
 0x353   : > { %v890_v60 = vmul.f32 1.442695, %v875_v59 }
 0x354   : > { %v861_v63 = vpop.xlane.xlu1 %860 }
 0x355   : > { %3084 = vpow2.f32 %v890_v60  ;;  %v873_v4 = vsub.f32 %v3842_v16, %v861_v63 }
 0x356   : > { %3086 = vpow2.f32 %v884_v61 }
 0x357   : > { %v886_v5 = vmul.f32 1.442695, %v873_v4 }
 0x358   : > { %v1050_v6 = vpop.permute.xlu1 %1049 }
 0x359   : > { %3088 = vpow2.f32 %v886_v5  ;;  %v1073_v7 = vsel %vm754_vm1, %v1050_v6, 0  ;;  %2931 = vmatprep.subr.msk.bf16.mxu0 %vm754_vm1, %v1050_v6 }
 0x35a   : > { %2763 = vmatpush3.bf16.xpose.msra.mxu0 %v1073_v7 }
 0x35b   : > { %2932 = vmatprep.subr.msk.bf16.mxu0 %vm754_vm1, %v1518_v8 }
 0x35c   : > { %v1034_v14 = vpop.permute.xlu1 %1033 }
 0x35f   : > { %v3911_v10 = vpop.eup %3084 }
 0x360   : > { %v919_v11 = vpack.c.bf16 %v3911_v10, %v3909_v9  ;;  %v3915_v12 = vpop.eup %3086  ;;  %v1038_v16 = vpop.permute.xlu1 %1037 }
 0x363   : > { %v3917_v13 = vpop.eup %3088 }
 0x364   : > { %v918_v15 = vpack.c.bf16 %v3917_v13, %v3915_v12  ;;  %v1520_v18 = vpop.permute.xlu1 %1519 }
 0x365   : > { %v1541_v21 = vsel %vm754_vm1, %v1520_v18, 0 }
 0x366   : > { %2752 = vmatprep.mubr.msk.bf16.mxu0 %vm416_vm0, %v918_v15 }
 0x367   : > { %2753 = vmatmul.mubr.msk.bf16.gmra.mrb[20].mxu0 %vm416_vm0, %v919_v11 }
 0x368   : > { %2764 = vmatprep.mubr.msk.bf16.mxu0 %vm754_vm1, %v1032_v55  ;;  %v1524_v23 = vpop.permute.xlu1 %1523 }
 0x369   : > { %v1547_v24 = vsel %vm754_vm1, %v1524_v23, 0 }
 0x36c   : > { %v1508_v25 = vpop.permute.xlu1 %1507 }
 0x36f   : > { %2765 = vmatmul.mubr.msk.bf16.vlgmr.msra.gmra.mrb[24].mxu0 %vm754_vm1, %v1034_v14 }
 0x370   : > { %2809 = vmatpush3.bf16.xpose.msra.mxu0 %v1538_v17  ;;  %2768 = vmatprep.mubr.msk.bf16.mxu0 %vm754_vm1, %v1036_v62  ;;  %v1512_v27 = vpop.permute.xlu1 %1511  ;;  %v913_v17 = vsel %vm416_vm0, %v3911_v10, 0.0 }
 0x371   : > { %2933 = vmatprep.subr.msk.bf16.mxu0 %vm754_vm1, %v1520_v18 }
 0x377   : > { %2769 = vmatmul.mubr.msk.bf16.gmra.mrb[28].mxu0 %vm754_vm1, %v1038_v16 }
 0x378   : > { %2811 = vmatpush3.bf16.xpose.msra.mxu0 %v1541_v21  ;;  %2816 = vmatprep.mubr.msk.bf16.mxu0 %vm754_vm1, %v1506_v20 }
 0x379   : > { %2934 = vmatprep.subr.msk.bf16.mxu0 %vm754_vm1, %v1522_v19 }
 0x380   : > { %2813 = vmatpush3.bf16.xpose.msra.mxu0 %v1544_v22 }
 0x381   : > { %2935 = vmatprep.subr.msk.bf16.mxu0 %vm754_vm1, %v1524_v23 }
 0x388   : > { %2815 = vmatpush3.bf16.xpose.msra.mxu0 %v1547_v24 }
 0x38f   : > { %2817 = vmatmul.mubr.msk.bf16.vlgmr.msra.gmra.mrb[32].mxu0 %vm754_vm1, %v1508_v25 }
 0x390   : > { %2820 = vmatprep.mubr.msk.bf16.mxu0 %vm754_vm1, %v1510_v26 }
 0x397   : > { %2821 = vmatmul.mubr.msk.bf16.gmra.mrb[36].mxu0 %vm754_vm1, %v1512_v27 }
 0x3fe   : > { %v3938_v28 = vpop.f32.mrb[16].mxu0 }
 0x3ff   : > { %v3940_v29 = vpop.f32.mrb[17].mxu0 }
 0x400   : > { %v3942_v30 = vpop.f32.mrb[18].mxu0 }
 0x401   : > { %v3944_v31 = vpop.f32.mrb[19].mxu0 }
 0x43a   : > { %v3946_v33 = vpop.f32.mrb[20].mxu0 }
 0x43b   : > { %v3948_v35 = vpop.f32.mrb[21].mxu0 }
 0x43c   : > { %v3950_v37 = vpop.f32.mrb[22].mxu0 }
 0x43d   : > { %v3952_v44 = vpop.f32.mrb[23].mxu0 }
 0x442   : > { %v3954_v45 = vpop.f32.mrb[24].mxu0 }
 0x443   : > { %v3956_v47 = vpop.f32.mrb[25].mxu0  ;;  %v1146_v49 = vsel %vm416_vm0, %v3954_v45, -inf }
 0x444   : > { %1147 = vmax.xlane.f32.xlu0 %v1146_v49  ;;  %v3960_v51 = vpop.f32.mrb[26].mxu0  ;;  %v1140_v54 = vsel %vm416_vm0, %v3956_v47, -inf }
 0x445   : > { %v3962_v52 = vpop.f32.mrb[27].mxu0  ;;  %v1149_v57 = vsel %vm416_vm0, %v3960_v51, -inf }
 0x446   : > { %v1143_v53 = vsel %vm416_vm0, %v3962_v52, -inf }
 0x447   : > { %1144 = vmax.xlane.f32.xlu1 %v1143_v53 }
 0x448   : > { %1141 = vmax.xlane.f32.xlu0 %v1140_v54 }
 0x44a   : > { %v3968_v55 = vpop.f32.mrb[28].mxu0 }
 0x44b   : > { %v3970_v56 = vpop.f32.mrb[29].mxu0  ;;  %v1158_v60 = vsel %vm416_vm0, %v3968_v55, -inf }
 0x44c   : > { %1150 = vmax.xlane.f32.xlu0 %v1149_v57  ;;  %v3974_v58 = vpop.f32.mrb[30].mxu0  ;;  %v1152_v61 = vsel %vm416_vm0, %v3970_v56, -inf }
 0x44d   : > { %v3976_v59 = vpop.f32.mrb[31].mxu0  ;;  %v1161_v14 = vsel %vm416_vm0, %v3974_v58, -inf }
 0x44e   : > { %v1155_v15 = vsel %vm416_vm0, %v3976_v59, -inf }
 0x450   : > { %1159 = vmax.xlane.f32.xlu0 %v1158_v60 }
 0x454   : > { %1153 = vmax.xlane.f32.xlu0 %v1152_v61 }
 0x458   : > { %1222 = vrot.lane.b32.xlu1 %v3814_v1, %s3445_s29 }
 0x45c   : > { %1224 = vrot.lane.b32.xlu1 %v3822_v2, %s3445_s29 }
 0x462   : > { %v3986_v62 = vpop.f32.mrb[32].mxu0 }
 0x463   : > { %v3988_v63 = vpop.f32.mrb[33].mxu0 }
 0x464   : > { %v3990_v4 = vpop.f32.mrb[34].mxu0 }
 0x465   : > { %v3992_v5 = vpop.f32.mrb[35].mxu0 }
 0x466   : > { %v1617_v10 = vsel %vm416_vm0, %v3992_v5, -inf }
 0x46a   : > { %v3994_v6 = vpop.f32.mrb[36].mxu0  ;;  %1220 = vrot.lane.b32.xlu0 %v3812_v0, %s3445_s29 }
 0x46b   : > { %v3998_v7 = vpop.f32.mrb[37].mxu0 }
 0x46c   : > { %v4000_v8 = vpop.f32.mrb[38].mxu0 }
 0x46d   : > { %v4002_v11 = vpop.f32.mrb[39].mxu0 }
 0x46e   : > { %1916 = vrot.lane.b32.xlu0 %v3768_v32, %s3447_s9  ;;  %v892_v32 = vsel %vm416_vm0, %v3884_v39, 0.0  ;;  %v907_v39 = vsel %vm416_vm0, %v3917_v13, 0.0  ;;  %v1623_v13 = vsel %vm416_vm0, %v3990_v4, -inf }
 0x472   : > { %1920 = vrot.lane.b32.xlu0 %v3784_v41, %s3447_s9  ;;  %v904_v41 = vsel %vm416_vm0, %v3915_v12, 0.0 }
 0x476   : > { %1904 = vrot.lane.b32.xlu0 %v3782_v40, %s3447_s9  ;;  %v898_v40 = vsel %vm416_vm0, %v3882_v36, 0.0  ;;  %v895_v36 = vsel %vm416_vm0, %v3889_v43, 0.0 }
 0x47a   : > { %1908 = vrot.lane.b32.xlu0 %v3794_v48, %s3447_s9  ;;  %v910_v48 = vsel %vm416_vm0, %v3909_v9, 0.0 }
 0x480   : > { %1162 = vmax.xlane.f32.xlu1 %v1161_v14 }
 0x484   : > { %1156 = vmax.xlane.f32.xlu1 %v1155_v15 }
 0x495   : > { %1226 = vrot.lane.b32.xlu1 %v3826_v3, %s3445_s29  ;;  %s3352_s29 = scalar_lea.vmem %s3351_s15, 2048 }
 0x496   : > { %p3354_p7 = scmp.lt.s32.totalorder %s3352_s29, %s3346_s27 }
 0x498   : > { %p3355_p9 = por %p3354_p7, %p3353_p3 }
 0x499   : > { %893 = vadd.xlane.f32.xlu0 %v892_v32  ;;  %1918 = vrot.lane.b32.xlu1 %v3776_v34, %s3447_s9  ;;  %v1620_v34 = vsel %vm416_vm0, %v3986_v62, -inf }
 0x49a   : > { %p3356_p0 = pnand %p3355_p9, %p3349_p10 }
 0x49d   : > { %899 = vadd.xlane.f32.xlu0 %v898_v40  ;;  %1922 = vrot.lane.b32.xlu1 %v3798_v50, %s3447_s9  ;;  %v1614_v50 = vsel %vm416_vm0, %v3988_v63, -inf }
 0x4a1   : > { %905 = vadd.xlane.f32.xlu0 %v904_v41  ;;  %1906 = vrot.lane.b32.xlu1 %v3780_v38, %s3447_s9  ;;  %v901_v38 = vsel %vm416_vm0, %v3887_v42, 0.0 }
 0x4a5   : > { %911 = vadd.xlane.f32.xlu0 %v910_v48  ;;  %1910 = vrot.lane.b32.xlu1 %v3792_v46, %s3447_s9 }
 0x4a9   : > { %1621 = vmax.xlane.f32.xlu0 %v1620_v34 }
 0x4ad   : > { %1615 = vmax.xlane.f32.xlu0 %v1614_v50 }
 0x4c9   : > { %896 = vadd.xlane.f32.xlu1 %v895_v36 }
 0x4cd   : > { %902 = vadd.xlane.f32.xlu1 %v901_v38 }
 0x4d1   : > { %v1148_v46 = vpop.xlane.xlu0 %1147  ;;  %908 = vadd.xlane.f32.xlu1 %v907_v39 }
 0x4d2   : > { %v1166_v9 = vsub.f32 %v3954_v45, %v1148_v46  ;;  %v1626_v46 = vsel %vm416_vm0, %v3998_v7, -inf }
 0x4d4   : > { %v1176_v12 = vmul.f32 1.442695, %v1166_v9  ;;  %v1145_v16 = vpop.xlane.xlu1 %1144  ;;  %v1632_v9 = vsel %vm416_vm0, %v3994_v6, -inf }
 0x4d5   : > { %v1165_v18 = vsub.f32 %v3962_v52, %v1145_v16  ;;  %v1142_v43 = vpop.xlane.xlu0 %1141  ;;  %914 = vadd.xlane.f32.xlu1 %v913_v17 }
 0x4d6   : > { %3090 = vpow2.f32 %v1176_v12  ;;  %v1164_v42 = vsub.f32 %v3956_v47, %v1142_v43 }
 0x4d7   : > { %v1174_v19 = vmul.f32 1.442695, %v1165_v18 }
 0x4d8   : > { %v1172_v20 = vmul.f32 1.442695, %v1164_v42  ;;  %v1223_v57 = vpop.permute.xlu1 %1222 }
 0x4d9   : > { %3092 = vpow2.f32 %v1174_v19  ;;  %v1151_v21 = vpop.xlane.xlu0 %1150  ;;  %1624 = vmax.xlane.f32.xlu1 %v1623_v13 }
 0x4da   : > { %3094 = vpow2.f32 %v1172_v20  ;;  %v1167_v22 = vsub.f32 %v3960_v51, %v1151_v21 }
 0x4dc   : > { %v1178_v23 = vmul.f32 1.442695, %v1167_v22  ;;  %v1225_v41 = vpop.permute.xlu1 %1224 }
 0x4dd   : > { %v1160_v24 = vpop.xlane.xlu0 %1159  ;;  %1618 = vmax.xlane.f32.xlu1 %v1617_v10 }
 0x4de   : > { %3096 = vpow2.f32 %v1178_v23  ;;  %v1170_v25 = vsub.f32 %v3968_v55, %v1160_v24 }
 0x4e0   : > { %v3091_v26 = vpop.eup %3090  ;;  %v1184_v27 = vmul.f32 1.442695, %v1170_v25  ;;  %v1629_v25 = vsel %vm416_vm0, %v4002_v11, -inf }
 0x4e1   : > { %v1154_v45 = vpop.xlane.xlu0 %1153  ;;  %v1194_v47 = vsel %vm416_vm0, %v3091_v26, 0.0 }
 0x4e2   : > { %3098 = vpow2.f32 %v1184_v27  ;;  %v1168_v49 = vsub.f32 %v3970_v56, %v1154_v45  ;;  %1195 = vadd.xlane.f32.xlu0 %v1194_v47 }
 0x4e3   : > { %v3093_v52 = vpop.eup %3092 }
 0x4e4   : > { %v3095_v51 = vpop.eup %3094  ;;  %v1180_v53 = vmul.f32 1.442695, %v1168_v49  ;;  %v1191_v54 = vsel %vm416_vm0, %v3093_v52, 0.0 }
 0x4e5   : > { %v1221_v60 = vpop.permute.xlu0 %1220  ;;  %1192 = vadd.xlane.f32.xlu1 %v1191_v54  ;;  %v1188_v61 = vsel %vm416_vm0, %v3095_v51, 0.0  ;;  %v1212_v55 = vpack.c.bf16 %v3093_v52, %v3095_v51  ;;  %v3070_v52 = vld [vmem:[#allocation12 + $0x8] sm:$0xff]  }
 0x4e6   : > { %3100 = vpow2.f32 %v1180_v53  ;;  %2772 = vmatprep.subr.bf16.mxu1 %v1221_v60  ;;  %1189 = vadd.xlane.f32.xlu0 %v1188_v61 }
 0x4e7   : > { %2773 = vmatpush3.bf16.msra.mxu1 %v1221_v60  ;;  %2780 = vmatprep.mubr.msk.bf16.mxu1 %vm416_vm0, %v1212_v55 }
 0x4e8   : > { %v3097_v14 = vpop.eup %3096  ;;  %2774 = vmatprep.subr.bf16.mxu1 %v1223_v57 }
 0x4e9   : > { %v1213_v56 = vpack.c.bf16 %v3097_v14, %v3091_v26  ;;  %v1917_v15 = vpop.permute.xlu0 %1916  ;;  %v1197_v32 = vsel %vm416_vm0, %v3097_v14, 0.0  ;;  %v1635_v26 = vsel %vm416_vm0, %v4000_v8, -inf }
 0x4ea   : > { %v1937_v40 = vsel %vm754_vm1, %v1917_v15, 0  ;;  %2936 = vmatprep.subr.msk.bf16.mxu0 %vm754_vm1, %v1917_v15  ;;  %1198 = vadd.xlane.f32.xlu0 %v1197_v32 }
 0x4eb   : > { %2775 = vmatpush3.bf16.msra.mxu1 %v1223_v57  ;;  %2851 = vmatpush3.bf16.xpose.msra.mxu0 %v1937_v40 }
 0x4ec   : > { %v3099_v48 = vpop.eup %3098  ;;  %2776 = vmatprep.subr.bf16.mxu1 %v1225_v41 }
 0x4ed   : > { %v1921_v34 = vpop.permute.xlu0 %1920  ;;  %v1206_v50 = vsel %vm416_vm0, %v3099_v48, 0.0 }
 0x4ee   : > { %1207 = vadd.xlane.f32.xlu0 %v1206_v50  ;;  %v1943_v10 = vsel %vm754_vm1, %v1921_v34, 0 }
 0x4ef   : > { %2777 = vmatpush3.bf16.msra.mxu1 %v1225_v41 }
 0x4f0   : > { %v3101_v36 = vpop.eup %3100 }
 0x4f1   : > { %v1905_v38 = vpop.permute.xlu0 %1904  ;;  %v1200_v39 = vsel %vm416_vm0, %v3101_v36, 0.0 }
 0x4f2   : > { %1201 = vadd.xlane.f32.xlu0 %v1200_v39  ;;  %2858 = vmatprep.mubr.msk.bf16.mxu0 %vm754_vm1, %v1905_v38 }
 0x4f5   : > { %v1909_v47 = vpop.permute.xlu0 %1908 }
 0x4f6   : > { %1627 = vmax.xlane.f32.xlu0 %v1626_v46 }
 0x4fa   : > { %1633 = vmax.xlane.f32.xlu0 %v1632_v9 }
 0x50d   : > { %v1163_v12 = vpop.xlane.xlu1 %1162 }
 0x50e   : > { %v1171_v16 = vsub.f32 %v3974_v58, %v1163_v12 }
 0x510   : > { %v1186_v17 = vmul.f32 1.442695, %v1171_v16  ;;  %1694 = vrot.lane.b32.xlu0 %v3812_v0, %s3446_s7 }
 0x511   : > { %v1157_v18 = vpop.xlane.xlu1 %1156 }
 0x512   : > { %3102 = vpow2.f32 %v1186_v17  ;;  %v1169_v43 = vsub.f32 %v3976_v59, %v1157_v18 }
 0x514   : > { %v1182_v42 = vmul.f32 1.442695, %v1169_v43 }
 0x515   : > { %v1227_v19 = vpop.permute.xlu1 %1226 }
 0x516   : > { %3104 = vpow2.f32 %v1182_v42  ;;  %2778 = vmatprep.subr.bf16.mxu1 %v1227_v19 }
 0x517   : > { %2779 = vmatpush3.bf16.msra.mxu1 %v1227_v19 }
 0x518   : > { %2788 = vmatprep.subr.bf16.mxu1 %v3070_v52 }
 0x519   : > { %v1919_v20 = vpop.permute.xlu1 %1918 }
 0x51a   : > { %v1940_v13 = vsel %vm754_vm1, %v1919_v20, 0  ;;  %2781 = vmatmul.mubr.msk.bf16.vlgmr.msra.gmra.mrb[16].mxu1 %vm416_vm0, %v1213_v56  ;;  %2937 = vmatprep.subr.msk.bf16.mxu0 %vm754_vm1, %v1919_v20 }
 0x51b   : > { %2853 = vmatpush3.bf16.xpose.msra.mxu0 %v1940_v13  ;;  %2789 = vmatpush3.bf16.msra.mxu1 %v3070_v52  ;;  %v3071_v13 = vld [vmem:[#allocation12] sm:$0xff]  }
 0x51c   : > { %v3103_v58 = vpop.eup %3102  ;;  %2938 = vmatprep.subr.msk.bf16.mxu0 %vm754_vm1, %v1921_v34  ;;  %2798 = vmatprep.subr.bf16.mxu1 %v3071_v13 }
 0x51d   : > { %v1209_v0 = vsel %vm416_vm0, %v3103_v58, 0.0  ;;  %v1215_v21 = vpack.c.bf16 %v3103_v58, %v3099_v48  ;;  %v1923_v24 = vpop.permute.xlu1 %1922 }
 0x51e   : > { %1210 = vadd.xlane.f32.xlu1 %v1209_v0  ;;  %v1946_v27 = vsel %vm754_vm1, %v1923_v24, 0 }
 0x520   : > { %v3105_v59 = vpop.eup %3104 }
 0x521   : > { %v1203_v22 = vsel %vm416_vm0, %v3105_v59, 0.0  ;;  %v1214_v23 = vpack.c.bf16 %v3105_v59, %v3101_v36  ;;  %v1907_v45 = vpop.permute.xlu1 %1906 }
 0x522   : > { %1204 = vadd.xlane.f32.xlu1 %v1203_v22 }
 0x523   : > { %2784 = vmatprep.mubr.msk.bf16.mxu1 %vm416_vm0, %v1214_v23  ;;  %2855 = vmatpush3.bf16.xpose.msra.mxu0 %v1943_v10 }
 0x524   : > { %2785 = vmatmul.mubr.msk.bf16.gmra.mrb[20].mxu1 %vm416_vm0, %v1215_v21  ;;  %2939 = vmatprep.subr.msk.bf16.mxu0 %vm754_vm1, %v1923_v24 }
 0x525   : > { %v1911_v49 = vpop.permute.xlu1 %1910 }
 0x526   : > { %1630 = vmax.xlane.f32.xlu1 %v1629_v25  ;;  %v894_v51 = vpop.xlane.xlu0 %893 }
 0x527   : > { %3106 = vrcp.f32 %v894_v51 }
 0x52a   : > { %1636 = vmax.xlane.f32.xlu1 %v1635_v26  ;;  %v900_v53 = vpop.xlane.xlu0 %899 }
 0x52b   : > { %2857 = vmatpush3.bf16.xpose.msra.mxu0 %v1946_v27 }
 0x52e   : > { %v906_v54 = vpop.xlane.xlu0 %905 }
 0x532   : > { %2859 = vmatmul.mubr.msk.bf16.vlgmr.msra.gmra.mrb[40].mxu0 %vm754_vm1, %v1907_v45  ;;  %v912_v60 = vpop.xlane.xlu0 %911 }
 0x533   : > { %2862 = vmatprep.mubr.msk.bf16.mxu0 %vm754_vm1, %v1909_v47 }
 0x53a   : > { %2863 = vmatmul.mubr.msk.bf16.gmra.mrb[44].mxu0 %vm754_vm1, %v1911_v49 }
 0x53b   : > { %1696 = vrot.lane.b32.xlu1 %v3814_v1, %s3446_s7  ;;  %v1622_v1 = vpop.xlane.xlu0 %1621 }
 0x53f   : > { %1698 = vrot.lane.b32.xlu1 %v3822_v2, %s3446_s7  ;;  %v3107_v2 = vpop.eup %3106  ;;  %v1616_v41 = vpop.xlane.xlu0 %1615 }
 0x540   : > { %v4100_v15 = vmul.f32 %v3107_v2, %v3940_v29 }
 0x543   : > { %1700 = vrot.lane.b32.xlu1 %v3826_v3, %s3446_s7  ;;  %v1640_v3 = vsub.f32 %v3986_v62, %v1622_v1  ;;  %v1638_v62 = vsub.f32 %v3988_v63, %v1616_v41 }
 0x545   : > { %v1650_v36 = vmul.f32 1.442695, %v1640_v3  ;;  %v1646_v16 = vmul.f32 1.442695, %v1638_v62 }
 0x556   : > { %v897_v57 = vpop.xlane.xlu1 %896 }
 0x557   : > { %3108 = vrcp.f32 %v897_v57 }
 0x558   : > { %3110 = vrcp.f32 %v900_v53 }
 0x55a   : > { %v903_v61 = vpop.xlane.xlu1 %902 }
 0x55b   : > { %3112 = vrcp.f32 %v903_v61 }
 0x55c   : > { %3114 = vrcp.f32 %v906_v54 }
 0x55e   : > { %v909_v55 = vpop.xlane.xlu1 %908 }
 0x55f   : > { %3116 = vrcp.f32 %v909_v55 }
 0x560   : > { %3118 = vrcp.f32 %v912_v60 }
 0x561   : > { %v3109_v14 = vpop.eup %3108 }
 0x562   : > { %v915_v56 = vpop.xlane.xlu1 %914  ;;  %v4103_v32 = vmul.f32 %v3109_v14, %v3944_v31  ;;  %v3111_v40 = vpop.eup %3110 }
 0x563   : > { %3120 = vrcp.f32 %v915_v56  ;;  %v4108_v50 = vmul.f32 %v3111_v40, %v3938_v28 }
 0x564   : > { %v1013_v48 = vpack.c.bf16 %v4103_v32, %v4100_v15  ;;  %3122 = vpow2.f32 %v1650_v36 }
 0x565   : > { %v3113_v34 = vpop.eup %3112 }
 0x566   : > { %v4112_v38 = vmul.f32 %v3113_v34, %v3942_v30  ;;  %v1625_v29 = vpop.xlane.xlu1 %1624  ;;  %v3115_v39 = vpop.eup %3114 }
 0x567   : > { %v1641_v31 = vsub.f32 %v3990_v4, %v1625_v29  ;;  %v4118_v28 = vmul.f32 %v3115_v39, %v3948_v35 }
 0x568   : > { %v1014_v46 = vpack.c.bf16 %v4112_v38, %v4108_v50 }
 0x569   : > { %v3117_v9 = vpop.eup %3116  ;;  %v1652_v12 = vmul.f32 1.442695, %v1641_v31 }
 0x56a   : > { %v1619_v17 = vpop.xlane.xlu1 %1618  ;;  %v4121_v63 = vmul.f32 %v3117_v9, %v3952_v44  ;;  %v3119_v30 = vpop.eup %3118 }
 0x56b   : > { %3124 = vpow2.f32 %v1652_v12  ;;  %v1639_v18 = vsub.f32 %v3992_v5, %v1619_v17  ;;  %v4127_v19 = vmul.f32 %v3119_v30, %v3946_v33 }
 0x56c   : > { %v1015_v4 = vpack.c.bf16 %v4121_v63, %v4118_v28  ;;  %3126 = vpow2.f32 %v1646_v16 }
 0x56d   : > { %v3121_v43 = vpop.eup %3120  ;;  %v1648_v42 = vmul.f32 1.442695, %v1639_v18 }
 0x56e   : > { %v4130_v20 = vmul.f32 %v3121_v43, %v3950_v37  ;;  %v4134_v44 = vpop.eup %3122 }
 0x56f   : > { %3128 = vpow2.f32 %v1648_v42  ;;  %v1196_v21 = vpop.xlane.xlu0 %1195 }
 0x570   : > { %v1016_v35 = vpack.c.bf16 %v4130_v20, %v4127_v19  ;;  %v1668_v20 = vsel %vm416_vm0, %v4134_v44, 0.0 }
 0x572   : > { %v1193_v24 = vpop.xlane.xlu1 %1192 }
 0x573   : > { %v1190_v59 = vpop.xlane.xlu0 %1189 }
 0x575   : > { %v4136_v5 = vpop.eup %3124 }
 0x576   : > { %v1687_v58 = vpack.c.bf16 %v4136_v5, %v4134_v44  ;;  %v4140_v0 = vpop.eup %3126 }
 0x577   : > { %v1199_v22 = vpop.xlane.xlu0 %1198 }
 0x579   : > { %v4142_v33 = vpop.eup %3128 }
 0x57a   : > { %v1686_v37 = vpack.c.bf16 %v4142_v33, %v4140_v0 }
 0x57b   : > { %v1208_v23 = vpop.xlane.xlu0 %1207 }
 0x57f   : > { %v1202_v10 = vpop.xlane.xlu0 %1201 }
 0x583   : > { %v1628_v25 = vpop.xlane.xlu0 %1627 }
 0x584   : > { %v1642_v27 = vsub.f32 %v3998_v7, %v1628_v25 }
 0x586   : > { %v1654_v49 = vmul.f32 1.442695, %v1642_v27 }
 0x587   : > { %v1634_v47 = vpop.xlane.xlu0 %1633 }
 0x588   : > { %v1644_v52 = vsub.f32 %v3994_v6, %v1634_v47  ;;  %3130 = vpow2.f32 %v1654_v49 }
 0x58a   : > { %v1658_v57 = vmul.f32 1.442695, %v1644_v52 }
 0x58b   : > { %v1695_v30 = vpop.permute.xlu0 %1694 }
 0x592   : > { %v4150_v55 = vpop.eup %3130 }
 0x5ab   : > { %v1211_v26 = vpop.xlane.xlu1 %1210 }
 0x5af   : > { %v1205_v45 = vpop.xlane.xlu1 %1204 }
 0x5b3   : > { %v1631_v51 = vpop.xlane.xlu1 %1630 }
 0x5b4   : > { %v1643_v53 = vsub.f32 %v4002_v11, %v1631_v51 }
 0x5b6   : > { %v1656_v54 = vmul.f32 1.442695, %v1643_v53 }
 0x5b7   : > { %v1637_v60 = vpop.xlane.xlu1 %1636 }
 0x5b8   : > { %3132 = vpow2.f32 %v1656_v54  ;;  %v1645_v61 = vsub.f32 %v4000_v8, %v1637_v60 }
 0x5b9   : > { %3134 = vpow2.f32 %v1658_v57 }
 0x5ba   : > { %v1660_v1 = vmul.f32 1.442695, %v1645_v61  ;;  %v1671_v61 = vsel %vm416_vm0, %v4136_v5, 0.0  ;;  %v3072_v5 = vld [vmem:[#allocation12 + $0x10] sm:$0xff]  }
 0x5bc   : > { %3136 = vpow2.f32 %v1660_v1  ;;  %v1900_v1 = vld [vmem:[#allocation3] sm:$0xff] }
 0x5bd   : > { %3138 = vrcp.f32 %v1196_v21 }
 0x5be   : > { %3140 = vrcp.f32 %v1193_v24 }
 0x5bf   : > { %3142 = vrcp.f32 %v1199_v22 }
 0x5c0   : > { %3144 = vrcp.f32 %v1190_v59 }
 0x5c1   : > { %3146 = vrcp.f32 %v1208_v23 }
 0x5c2   : > { %v4152_v7 = vpop.eup %3132  ;;  %3148 = vrcp.f32 %v1202_v10 }
 0x5c3   : > { %v1688_v6 = vpack.c.bf16 %v4152_v7, %v4150_v55  ;;  %v4156_v2 = vpop.eup %3134  ;;  %3150 = vrcp.f32 %v1211_v26 }
 0x5c4   : > { %3152 = vrcp.f32 %v1205_v45  ;;  %v1680_v44 = vsel %vm416_vm0, %v4156_v2, 0.0 }
 0x5c6   : > { %v4158_v11 = vpop.eup %3136 }
 0x5c7   : > { %v1689_v14 = vpack.c.bf16 %v4158_v11, %v4156_v2  ;;  %v3139_v8 = vpop.eup %3138  ;;  %v3203_v2 = vld [vmem:[#allocation3 + $0x18] sm:$0xff] }
 0x5c8   : > { %v3141_v56 = vpop.eup %3140 }
 0x5c9   : > { %v3143_v41 = vpop.eup %3142 }
 0x5ca   : > { %v3145_v36 = vpop.eup %3144 }
 0x5cb   : > { %v3147_v17 = vpop.eup %3146 }
 0x5cc   : > { %v3149_v43 = vpop.eup %3148 }
 0x5cd   : > { %v3151_v21 = vpop.eup %3150 }
 0x5ce   : > { %v3153_v22 = vpop.eup %3152 }
 0x5ed   : > { %v2782_v3 = vpop.f32.mrb[16].mxu1 }
 0x5ee   : > { %v1278_v40 = vpop.f32.mrb[17].mxu1  ;;  %v1319_v62 = vmul.f32 %v3139_v8, %v2782_v3 }
 0x5ef   : > { %v2783_v34 = vpop.f32.mrb[18].mxu1  ;;  %v1317_v31 = vmul.f32 %v3145_v36, %v1278_v40 }
 0x5f0   : > { %v1320_v29 = vmul.f32 %v3143_v41, %v2783_v34  ;;  %v1281_v39 = vpop.f32.mrb[19].mxu1 }
 0x5f1   : > { %v1318_v9 = vmul.f32 %v3141_v56, %v1281_v39 }
 0x5f2   : > { %v1326_v12 = vpack.c.bf16 %v1320_v29, %v1319_v62 }
 0x5f3   : > { %v1325_v16 = vpack.c.bf16 %v1318_v9, %v1317_v31 }
 0x5f5   : > { %2790 = vmatprep.mubr.msk.bf16.mxu1 %vm754_vm1, %v1325_v16 }
 0x5f6   : > { %2791 = vmatmul.mubr.msk.bf16.vlgmr.msra.gmra.mrb[24].mxu1 %vm754_vm1, %v1326_v12 }
 0x5f7   : > { %2799 = vmatpush3.bf16.msra.mxu1 %v3071_v13  ;;  %v2786_v18 = vpop.f32.mrb[20].mxu1  ;;  %v1697_v13 = vpop.permute.xlu1 %1696 }
 0x5f8   : > { %2824 = vmatprep.subr.bf16.mxu1 %v1695_v30  ;;  %v1294_v42 = vpop.f32.mrb[21].mxu1  ;;  %v1323_v23 = vmul.f32 %v3147_v17, %v2786_v18 }
 0x5f9   : > { %v2787_v59 = vpop.f32.mrb[22].mxu1  ;;  %v1321_v25 = vmul.f32 %v3149_v43, %v1294_v42 }
 0x5fa   : > { %v1324_v10 = vmul.f32 %v3151_v21, %v2787_v59  ;;  %v1297_v24 = vpop.f32.mrb[23].mxu1 }
 0x5fb   : > { %v1322_v26 = vmul.f32 %v3153_v22, %v1297_v24  ;;  %v1699_v32 = vpop.permute.xlu1 %1698 }
 0x5fc   : > { %v1328_v27 = vpack.c.bf16 %v1324_v10, %v1323_v23 }
 0x5fd   : > { %v1327_v45 = vpack.c.bf16 %v1322_v26, %v1321_v25 }
 0x5ff   : > { %2794 = vmatprep.mubr.msk.bf16.mxu1 %vm754_vm1, %v1327_v45  ;;  %v1701_v54 = vpop.permute.xlu1 %1700 }
 0x600   : > { %2795 = vmatmul.mubr.msk.bf16.gmra.mrb[28].mxu1 %vm754_vm1, %v1328_v27 }
 0x601   : > { %2800 = vmatprep.mubr.msk.bf16.mxu1 %vm754_vm1, %v1013_v48 }
 0x605   : > { %v4170_v47 = vpop.f32.mrb[40].mxu0 }
 0x606   : > { %v4172_v49 = vpop.f32.mrb[41].mxu0  ;;  %v2019_v48 = vsel %vm416_vm0, %v4170_v47, -inf }
 0x607   : > { %v4174_v52 = vpop.f32.mrb[42].mxu0  ;;  %v2013_v51 = vsel %vm416_vm0, %v4172_v49, -inf }
 0x608   : > { %2014 = vmax.xlane.f32.xlu0 %v2013_v51  ;;  %2801 = vmatmul.mubr.msk.bf16.vlgmr.msra.gmra.mrb[24].mxu1 %vm754_vm1, %v1014_v46  ;;  %v4182_v53 = vpop.f32.mrb[43].mxu0  ;;  %v2022_v38 = vsel %vm416_vm0, %v4174_v52, -inf }
 0x609   : > { %2825 = vmatpush3.bf16.msra.mxu1 %v1695_v30  ;;  %2804 = vmatprep.mubr.msk.bf16.mxu1 %vm754_vm1, %v1015_v4  ;;  %v2016_v15 = vsel %vm416_vm0, %v4182_v53, -inf }
 0x60a   : > { %2826 = vmatprep.subr.bf16.mxu1 %v1697_v13  ;;  %2017 = vmax.xlane.f32.xlu1 %v2016_v15 }
 0x60c   : > { %2020 = vmax.xlane.f32.xlu0 %v2019_v48 }
 0x60d   : > { %2827 = vmatpush3.bf16.msra.mxu1 %v1697_v13  ;;  %v4192_v50 = vpop.f32.mrb[44].mxu0 }
 0x60e   : > { %2828 = vmatprep.subr.bf16.mxu1 %v1699_v32  ;;  %2023 = vmax.xlane.f32.xlu1 %v2022_v38  ;;  %v4196_v46 = vpop.f32.mrb[45].mxu0  ;;  %v2031_v60 = vsel %vm416_vm0, %v4192_v50, -inf }
 0x60f   : > { %v4198_v28 = vpop.f32.mrb[46].mxu0  ;;  %v2025_v63 = vsel %vm416_vm0, %v4196_v46, -inf }
 0x610   : > { %2026 = vmax.xlane.f32.xlu0 %v2025_v63  ;;  %2805 = vmatmul.mubr.msk.bf16.gmra.mrb[28].mxu1 %vm754_vm1, %v1016_v35  ;;  %v4206_v4 = vpop.f32.mrb[47].mxu0  ;;  %v2034_v19 = vsel %vm416_vm0, %v4198_v28, -inf  ;;  %v1665_v35 = vsel %vm416_vm0, %v4142_v33, 0.0  ;;  %v1901_v33 = vld [vmem:[#allocation3 + $0x8] sm:$0xff] }
 0x611   : > { %2829 = vmatpush3.bf16.msra.mxu1 %v1699_v32  ;;  %2832 = vmatprep.mubr.msk.bf16.mxu1 %vm416_vm0, %v1686_v37  ;;  %v2028_v57 = vsel %vm416_vm0, %v4206_v4, -inf  ;;  %v1662_v37 = vsel %vm416_vm0, %v4140_v0, 0.0  ;;  %v3202_v0 = vld [vmem:[#allocation3 + $0x10] sm:$0xff] }
 0x612   : > { %2830 = vmatprep.subr.bf16.mxu1 %v1701_v54  ;;  %2029 = vmax.xlane.f32.xlu1 %v2028_v57 }
 0x614   : > { %2032 = vmax.xlane.f32.xlu0 %v2031_v60 }
 0x615   : > { %2831 = vmatpush3.bf16.msra.mxu1 %v1701_v54 }
 0x616   : > { %2035 = vmax.xlane.f32.xlu1 %v2034_v19  ;;  %2840 = vmatprep.subr.bf16.mxu1 %v3072_v5 }
 0x618   : > { %1669 = vadd.xlane.f32.xlu0 %v1668_v20  ;;  %2833 = vmatmul.mubr.msk.bf16.vlgmr.msra.gmra.mrb[32].mxu1 %vm416_vm0, %v1687_v58  ;;  %v1674_v58 = vsel %vm416_vm0, %v4150_v55, 0.0  ;;  %v1677_v55 = vsel %vm416_vm0, %v4152_v7, 0.0 }
 0x619   : > { %2836 = vmatprep.mubr.msk.bf16.mxu1 %vm416_vm0, %v1688_v6  ;;  %2841 = vmatpush3.bf16.msra.mxu1 %v3072_v5  ;;  %v1683_v6 = vsel %vm416_vm0, %v4158_v11, 0.0 }
 0x61a   : > { %1666 = vadd.xlane.f32.xlu1 %v1665_v35 }
 0x61c   : > { %1663 = vadd.xlane.f32.xlu0 %v1662_v37 }
 0x620   : > { %1672 = vadd.xlane.f32.xlu0 %v1671_v61  ;;  %2837 = vmatmul.mubr.msk.bf16.gmra.mrb[36].mxu1 %vm416_vm0, %v1689_v14 }
 0x624   : > { %1681 = vadd.xlane.f32.xlu0 %v1680_v44 }
 0x628   : > { %1675 = vadd.xlane.f32.xlu0 %v1674_v58 }
 0x62b   : > { %2095 = vrot.lane.b32.xlu1 %v1901_v33, %s3447_s9 }
 0x62f   : > { %2097 = vrot.lane.b32.xlu1 %v3202_v0, %s3447_s9 }
 0x63e   : > { %2093 = vrot.lane.b32.xlu0 %v1900_v1, %s3447_s9 }
 0x653   : > { %1684 = vadd.xlane.f32.xlu1 %v1683_v6 }
 0x657   : > { %1678 = vadd.xlane.f32.xlu1 %v1677_v55 }
 0x668   : > { %2099 = vrot.lane.b32.xlu1 %v3203_v2, %s3447_s9 }
 0x695   : > { %v2015_v14 = vpop.xlane.xlu0 %2014 }
 0x696   : > { %v2037_v8 = vsub.f32 %v4172_v49, %v2015_v14 }
 0x697   : > { %v2018_v3 = vpop.xlane.xlu1 %2017 }
 0x698   : > { %v2045_v56 = vmul.f32 1.442695, %v2037_v8  ;;  %v2038_v40 = vsub.f32 %v4182_v53, %v2018_v3 }
 0x699   : > { %v2021_v41 = vpop.xlane.xlu0 %2020 }
 0x69a   : > { %3154 = vpow2.f32 %v2045_v56  ;;  %v2047_v34 = vmul.f32 1.442695, %v2038_v40  ;;  %v2039_v11 = vsub.f32 %v4170_v47, %v2021_v41 }
 0x69b   : > { %v2024_v36 = vpop.xlane.xlu1 %2023 }
 0x69c   : > { %3156 = vpow2.f32 %v2047_v34  ;;  %v2049_v62 = vmul.f32 1.442695, %v2039_v11  ;;  %v2040_v7 = vsub.f32 %v4174_v52, %v2024_v36 }
 0x69d   : > { %v2027_v29 = vpop.xlane.xlu0 %2026 }
 0x69e   : > { %3158 = vpow2.f32 %v2049_v62  ;;  %v2051_v39 = vmul.f32 1.442695, %v2040_v7  ;;  %v2041_v31 = vsub.f32 %v4196_v46, %v2027_v29 }
 0x69f   : > { %v2030_v9 = vpop.xlane.xlu1 %2029 }
 0x6a0   : > { %3160 = vpow2.f32 %v2051_v39  ;;  %v2053_v12 = vmul.f32 1.442695, %v2041_v31  ;;  %v2042_v16 = vsub.f32 %v4206_v4, %v2030_v9 }
 0x6a1   : > { %v2033_v17 = vpop.xlane.xlu0 %2032 }
 0x6a2   : > { %v2055_v30 = vmul.f32 1.442695, %v2042_v16  ;;  %v2043_v18 = vsub.f32 %v4192_v50, %v2033_v17  ;;  %3162 = vpow2.f32 %v2053_v12 }
 0x6a3   : > { %v2036_v43 = vpop.xlane.xlu1 %2035 }
 0x6a4   : > { %v3155_v42 = vpop.eup %3154  ;;  %3164 = vpow2.f32 %v2055_v30  ;;  %v2057_v21 = vmul.f32 1.442695, %v2043_v18  ;;  %v2044_v59 = vsub.f32 %v4198_v28, %v2036_v43  ;;  %v3073_v43 = vld [vmem:[#allocation12 + $0x18] sm:$0xff]  }
 0x6a5   : > { %v1670_v22 = vpop.xlane.xlu0 %1669  ;;  %v2061_v23 = vsel %vm416_vm0, %v3155_v42, 0.0 }
 0x6a6   : > { %v3157_v10 = vpop.eup %3156  ;;  %v2059_v24 = vmul.f32 1.442695, %v2044_v59  ;;  %2062 = vadd.xlane.f32.xlu0 %v2061_v23  ;;  %3166 = vpow2.f32 %v2057_v21 }
 0x6a7   : > { %v2064_v25 = vsel %vm416_vm0, %v3157_v10, 0.0  ;;  %v2085_v26 = vpack.c.bf16 %v3157_v10, %v3155_v42  ;;  %v1667_v4 = vpop.xlane.xlu1 %1666 }
 0x6a8   : > { %v3159_v27 = vpop.eup %3158  ;;  %3168 = vpow2.f32 %v2059_v24  ;;  %2065 = vadd.xlane.f32.xlu1 %v2064_v25 }
 0x6a9   : > { %v1664_v45 = vpop.xlane.xlu0 %1663  ;;  %2874 = vmatprep.mubr.msk.bf16.mxu0 %vm416_vm0, %v2085_v26  ;;  %v2067_v13 = vsel %vm416_vm0, %v3159_v27, 0.0  ;;  %3170 = vrcp.f32 %v1670_v22 }
 0x6aa   : > { %v3161_v47 = vpop.eup %3160  ;;  %2068 = vadd.xlane.f32.xlu0 %v2067_v13  ;;  %3172 = vrcp.f32 %v1667_v4 }
 0x6ab   : > { %v2086_v49 = vpack.c.bf16 %v3161_v47, %v3159_v27  ;;  %v2070_v53 = vsel %vm416_vm0, %v3161_v47, 0.0  ;;  %v2096_v19 = vpop.permute.xlu1 %2095 }
 0x6ac   : > { %v4262_v52 = vpop.eup %3162 }
 0x6ad   : > { %v1673_v51 = vpop.xlane.xlu0 %1672  ;;  %v2073_v46 = vsel %vm416_vm0, %v4262_v52, 0.0 }
 0x6ae   : > { %v4265_v15 = vpop.eup %3164  ;;  %2071 = vadd.xlane.f32.xlu0 %v2070_v53  ;;  %3174 = vrcp.f32 %v1673_v51 }
 0x6af   : > { %v2076_v32 = vsel %vm416_vm0, %v4265_v15, 0.0  ;;  %v2087_v48 = vpack.c.bf16 %v4265_v15, %v4262_v52  ;;  %v2098_v35 = vpop.permute.xlu1 %2097  ;;  %3176 = vrcp.f32 %v1664_v45 }
 0x6b0   : > { %2077 = vadd.xlane.f32.xlu1 %v2076_v32  ;;  %v4271_v50 = vpop.eup %3166 }
 0x6b1   : > { %v1682_v38 = vpop.xlane.xlu0 %1681  ;;  %v2079_v60 = vsel %vm416_vm0, %v4271_v50, 0.0 }
 0x6b2   : > { %v4275_v28 = vpop.eup %3168  ;;  %2074 = vadd.xlane.f32.xlu0 %v2073_v46  ;;  %3178 = vrcp.f32 %v1682_v38 }
 0x6b3   : > { %v2088_v63 = vpack.c.bf16 %v4275_v28, %v4271_v50  ;;  %v2082_v54 = vsel %vm416_vm0, %v4275_v28, 0.0  ;;  %v3171_v58 = vpop.eup %3170 }
 0x6b4   : > { %2083 = vadd.xlane.f32.xlu1 %v2082_v54  ;;  %v3173_v0 = vpop.eup %3172 }
 0x6b5   : > { %v1676_v57 = vpop.xlane.xlu0 %1675 }
 0x6b6   : > { %2080 = vadd.xlane.f32.xlu0 %v2079_v60  ;;  %3180 = vrcp.f32 %v1676_v57 }
 0x6b8   : > { %v3175_v1 = vpop.eup %3174 }
 0x6b9   : > { %v2094_v20 = vpop.permute.xlu0 %2093  ;;  %v3177_v55 = vpop.eup %3176 }
 0x6ba   : > { %2866 = vmatprep.subr.bf16.mxu0 %v2094_v20  ;;  %2892 = vmatprep.subr.bf16.mxu1 %v2094_v20 }
 0x6bb   : > { %2867 = vmatpush3.bf16.msra.mxu0 %v2094_v20 }
 0x6bc   : > { %2868 = vmatprep.subr.bf16.mxu0 %v2096_v19  ;;  %v3179_v34 = vpop.eup %3178 }
 0x6bf   : > { %2869 = vmatpush3.bf16.msra.mxu0 %v2096_v19 }
 0x6c0   : > { %2870 = vmatprep.subr.bf16.mxu0 %v2098_v35  ;;  %v3181_v36 = vpop.eup %3180 }
 0x6c3   : > { %2871 = vmatpush3.bf16.msra.mxu0 %v2098_v35 }
 0x6e0   : > { %v1685_v37 = vpop.xlane.xlu1 %1684 }
 0x6e1   : > { %3182 = vrcp.f32 %v1685_v37 }
 0x6e4   : > { %v1679_v61 = vpop.xlane.xlu1 %1678 }
 0x6e5   : > { %3184 = vrcp.f32 %v1679_v61 }
 0x6e8   : > { %v2100_v44 = vpop.permute.xlu1 %2099 }
 0x6e9   : > { %2872 = vmatprep.subr.bf16.mxu0 %v2100_v44 }
 0x6ea   : > { %2873 = vmatpush3.bf16.msra.mxu0 %v2100_v44 }
 0x6eb   : > { %v2834_v33 = vpop.f32.mrb[32].mxu1  ;;  %v3183_v7 = vpop.eup %3182 }
 0x6ec   : > { %v1752_v5 = vpop.f32.mrb[33].mxu1  ;;  %v1793_v2 = vmul.f32 %v3171_v58, %v2834_v33  ;;  %v2560_v33 = vld [vmem:[%s4372_s5] ss:$0 sm:$0xff] }
 0x6ed   : > { %v2835_v6 = vpop.f32.mrb[34].mxu1  ;;  %2875 = vmatmul.mubr.msk.bf16.vlgmr.msra.gmra.mrb[48].mxu0 %vm416_vm0, %v2086_v49  ;;  %v1791_v3 = vmul.f32 %v3177_v55, %v1752_v5 }
 0x6ee   : > { %v1794_v14 = vmul.f32 %v3175_v1, %v2835_v6  ;;  %v1755_v8 = vpop.f32.mrb[35].mxu1 }
 0x6ef   : > { %v1792_v56 = vmul.f32 %v3173_v0, %v1755_v8  ;;  %v3185_v39 = vpop.eup %3184 }
 0x6f0   : > { %v1800_v40 = vpack.c.bf16 %v1794_v14, %v1793_v2 }
 0x6f1   : > { %v1799_v41 = vpack.c.bf16 %v1792_v56, %v1791_v3 }
 0x6f3   : > { %v2838_v11 = vpop.f32.mrb[36].mxu1  ;;  %2842 = vmatprep.mubr.msk.bf16.mxu1 %vm754_vm1, %v1799_v41 }
 0x6f4   : > { %v1768_v62 = vpop.f32.mrb[37].mxu1  ;;  %2843 = vmatmul.mubr.msk.bf16.vlgmr.msra.gmra.mrb[24].mxu1 %vm754_vm1, %v1800_v40  ;;  %v1797_v31 = vmul.f32 %v3179_v34, %v2838_v11 }
 0x6f5   : > { %2896 = vmatpush3.bf16.msra.mxu1 %v2094_v20  ;;  %v2839_v29 = vpop.f32.mrb[38].mxu1  ;;  %v1795_v16 = vmul.f32 %v3181_v36, %v1768_v62 }
 0x6f6   : > { %v1798_v9 = vmul.f32 %v3183_v7, %v2839_v29  ;;  %2893 = vmatprep.subr.bf16.mxu1 %v2096_v19  ;;  %v1771_v12 = vpop.f32.mrb[39].mxu1 }
 0x6f7   : > { %v1796_v17 = vmul.f32 %v3185_v39, %v1771_v12 }
 0x6f8   : > { %v1802_v30 = vpack.c.bf16 %v1798_v9, %v1797_v31 }
 0x6f9   : > { %v1801_v18 = vpack.c.bf16 %v1796_v17, %v1795_v16  ;;  %2897 = vmatpush3.bf16.msra.mxu1 %v2096_v19 }
 0x6fa   : > { %2894 = vmatprep.subr.bf16.mxu1 %v2098_v35 }
 0x6fb   : > { %2846 = vmatprep.mubr.msk.bf16.mxu1 %vm754_vm1, %v1801_v18 }
 0x6fc   : > { %2847 = vmatmul.mubr.msk.bf16.gmra.mrb[28].mxu1 %vm754_vm1, %v1802_v30 }
 0x6fd   : > { %2898 = vmatpush3.bf16.msra.mxu1 %v2098_v35  ;;  %2878 = vmatprep.mubr.msk.bf16.mxu1 %vm416_vm0, %v2087_v48 }
 0x6fe   : > { %2895 = vmatprep.subr.bf16.mxu1 %v2100_v44 }
 0x701   : > { %2899 = vmatpush3.bf16.msra.mxu1 %v2100_v44 }
 0x702   : > { %2882 = vmatprep.subr.bf16.mxu1 %v3073_v43 }
 0x704   : > { %2879 = vmatmul.mubr.msk.bf16.vlgmr.msra.gmra.mrb[40].mxu1 %vm416_vm0, %v2088_v63 }
 0x705   : > { %2883 = vmatpush3.bf16.msra.mxu1 %v3073_v43 }
 0x733   : > { %v2063_v42 = vpop.xlane.xlu0 %2062 }
 0x734   : > { %3186 = vrcp.f32 %v2063_v42 }
 0x735   : > { %v2066_v22 = vpop.xlane.xlu1 %2065 }
 0x737   : > { %v2069_v21 = vpop.xlane.xlu0 %2068 }
 0x738   : > { %3188 = vrcp.f32 %v2069_v21 }
 0x73b   : > { %v2072_v59 = vpop.xlane.xlu0 %2071 }
 0x73c   : > { %3190 = vrcp.f32 %v2072_v59 }
 0x73d   : > { %3192 = vrcp.f32 %v2066_v22  ;;  %v2078_v53 = vpop.xlane.xlu1 %2077 }
 0x73e   : > { %v3187_v23 = vpop.eup %3186  ;;  %3194 = vrcp.f32 %v2078_v53 }
 0x73f   : > { %v2075_v32 = vpop.xlane.xlu0 %2074 }
 0x741   : > { %v2084_v50 = vpop.xlane.xlu1 %2083 }
 0x742   : > { %v3189_v24 = vpop.eup %3188  ;;  %3196 = vrcp.f32 %v2084_v50 }
 0x743   : > { %v2081_v38 = vpop.xlane.xlu0 %2080 }
 0x744   : > { %3198 = vrcp.f32 %v2081_v38 }
 0x745   : > { %3200 = vrcp.f32 %v2075_v32 }
 0x746   : > { %v3191_v26 = vpop.eup %3190 }
 0x747   : > { %v3193_v45 = vpop.eup %3192 }
 0x748   : > { %v3195_v46 = vpop.eup %3194 }
 0x74c   : > { %v3197_v63 = vpop.eup %3196 }
 0x74e   : > { %v3199_v54 = vpop.eup %3198 }
 0x74f   : > { %v3201_v60 = vpop.eup %3200 }
 0x7c0   : > { %v2876_v10 = vpop.f32.mrb[48].mxu0 }
 0x7c1   : > { %v2151_v25 = vpop.f32.mrb[49].mxu0  ;;  %v2192_v13 = vmul.f32 %v3189_v24, %v2876_v10 }
 0x7c2   : > { %v2877_v27 = vpop.f32.mrb[50].mxu0  ;;  %v2190_v52 = vmul.f32 %v3187_v23, %v2151_v25 }
 0x7c3   : > { %v2193_v47 = vmul.f32 %v3191_v26, %v2877_v27  ;;  %v2154_v49 = vpop.f32.mrb[51].mxu0 }
 0x7c4   : > { %v2191_v51 = vmul.f32 %v3193_v45, %v2154_v49 }
 0x7c5   : > { %v2199_v15 = vpack.c.bf16 %v2193_v47, %v2192_v13 }
 0x7c6   : > { %v2198_v48 = vpack.c.bf16 %v2191_v51, %v2190_v52 }
 0x7c8   : > { %2884 = vmatprep.mubr.msk.bf16.mxu1 %vm754_vm1, %v2198_v48 }
 0x7c9   : > { %2885 = vmatmul.mubr.msk.bf16.vlgmr.msra.gmra.mrb[24].mxu1 %vm754_vm1, %v2199_v15 }
 0x7d7   : > { %v2880_v28 = vpop.f32.mrb[40].mxu1 }
 0x7d8   : > { %v2167_v4 = vpop.f32.mrb[41].mxu1  ;;  %v2196_v19 = vmul.f32 %v3199_v54, %v2880_v28 }
 0x7d9   : > { %v2881_v57 = vpop.f32.mrb[42].mxu1  ;;  %v2194_v37 = vmul.f32 %v3201_v60, %v2167_v4 }
 0x7da   : > { %v2197_v20 = vmul.f32 %v3197_v63, %v2881_v57  ;;  %v2170_v35 = vpop.f32.mrb[43].mxu1 }
 0x7db   : > { %v2195_v61 = vmul.f32 %v3195_v46, %v2170_v35 }
 0x7dc   : > { %v2201_v44 = vpack.c.bf16 %v2197_v20, %v2196_v19 }
 0x7dd   : > { %v2200_v58 = vpack.c.bf16 %v2195_v61, %v2194_v37 }
 0x7df   : > { %2888 = vmatprep.mubr.msk.bf16.mxu1 %vm754_vm1, %v2200_v58 }
 0x7e0   : > { %2889 = vmatmul.mubr.msk.bf16.gmra.mrb[28].mxu1 %vm754_vm1, %v2201_v44 }
 0x89c   : > { %v2886_v0 = vpop.f32.mrb[24].mxu1 }
 0x89d   : > { %v2304_v5 = vadd.f32 %v2886_v0, %v2560_v33  ;;  %v2256_v1 = vpop.f32.mrb[25].mxu1 }
 0x89e   : > { %v2302_v6 = vadd.f32 %v2560_v33, %v2256_v1  ;;  %v2887_v55 = vpop.f32.mrb[26].mxu1 }
 0x89f   : > { %2312 = vst.msk [vmem:[%s341_s16 + $0x10] sm:$0xff] %vm416_vm0, %v2304_v5  ;;  %v2305_v2 = vadd.f32 %v2887_v55, %v2560_v33  ;;  %v2259_v14 = vpop.f32.mrb[27].mxu1 }
 0x8a0   : > { %2310 = vst.msk [vmem:[%s341_s16] sm:$0xff] %vm416_vm0, %v2302_v6  ;;  %v2303_v8 = vadd.f32 %v2560_v33, %v2259_v14 }
 0x8a1   : > { %2313 = vst.msk [vmem:[%s341_s16 + $0x18] sm:$0xff] %vm416_vm0, %v2305_v2 }
 0x8a2   : > { %2311 = vst.msk [vmem:[%s341_s16 + $0x8] sm:$0xff] %vm416_vm0, %v2303_v8 }
 0x8b3   : > { %v2890_v3 = vpop.f32.mrb[28].mxu1 }
 0x8b4   : > { %v2308_v56 = vadd.f32 %v2890_v3, %v2560_v33  ;;  %v2272_v40 = vpop.f32.mrb[29].mxu1 }
 0x8b5   : > { %v2306_v41 = vadd.f32 %v2560_v33, %v2272_v40  ;;  %v2891_v34 = vpop.f32.mrb[30].mxu1 }
 0x8b6   : > { %2316 = vst.msk [vmem:[%s341_s16 + $0x30] sm:$0xff] %vm416_vm0, %v2308_v56  ;;  %v2309_v11 = vadd.f32 %v2891_v34, %v2560_v33  ;;  %v2275_v36 = vpop.f32.mrb[31].mxu1 }
 0x8b7   : > { %2314 = vst.msk [vmem:[%s341_s16 + $0x20] sm:$0xff] %vm416_vm0, %v2306_v41  ;;  %v2307_v62 = vadd.f32 %v2560_v33, %v2275_v36 }
 0x8b8   : > { %2317 = vst.msk [vmem:[%s341_s16 + $0x38] sm:$0xff] %vm416_vm0, %v2309_v11 }
 0x8b9   : > { %2315 = vst.msk [vmem:[%s341_s16 + $0x28] sm:$0xff] %vm416_vm0, %v2307_v62 }
 0x8ba   : > { %3359 = shalt.err (!%p3356_p0)
}
 0x8bb   : > { %s3360_s7 = scalar_lea.hbm %s4313_s8, 1024  ;;  %s3364_s18 = scalar_lea.hbm %s4397_s19, 2048 }
 0x8bc   : > { %p3361_p4 = scmp.ne.s32.totalorder %s4313_s8, %s3360_s7  ;;  %p3365_p12 = scmp.lt.u32.totalorder %s4313_s8, %s4397_s19 }
 0x8bd   : > { %p3366_p1 = scmp.lt.u32.totalorder %s3364_s18, %s3360_s7  ;;  %p3368_p8 = scmp.lt.u32.totalorder %s3360_s7, %s4313_s8 }
 0x8be   : > { %p3362_p13 = pnand %p3361_p4, %p3670_p5 }
 0x8bf   : > { %p3367_p11 = por %p3366_p1, %p3365_p12 }
 0x8c0   : > { %p3363_p2 = pneg %p3362_p13 }
 0x8c1   : > { %p3369_p6 = por %p3368_p8, %p3367_p11 }
 0x8c3   : > { %p3370_p10 = pnand %p3369_p6, %p3363_p2 }
 0x8c5   : > { %3373 = shalt.err (!%p3370_p10)
}
 0x8c6   : > { %s3449_s14 = smov 128   ;;  %s3450_s20 = smov 8  }
 0x8c7   : > { %2958 = dma.vmem_to_hbm [thread:$0]  (%p3670_p5), %s4315_s6, 1024, %s4313_s8, %s2319_s24, %s3449_s14, %s3449_s14, %s3450_s20  }
 0x8c8 PF: > { %s4398_s30 = sld [smem:[#allocation18_spill]]  ;;  %s4399_s27 = sld [smem:[#allocation19_spill]] }
 0x8c9   : > { %p4401_p7 = scmp.ge.s32.totalorder %s3436_s26, 2 }
 0x8ce   : > { %s2349_s13 = sand.u32 1, %s4398_s30   ;;  %p4400_p3 = scmp.ne.s32.totalorder %s4399_s27, 0 }
 0x8cf   : > { %s2350_s15 = scalar_lea.sflag [#allocation6], %s2349_s13 }
 0x8d0   : > { %p2978_p9 = pnand %p4401_p7, %p4400_p3 }
 0x8d2   : > { %3411 = dma.done.wait (!%p2978_p9), %s2350_s15, 1024  }
 0x8d3   : > { %3413 = vsyncadd (!%p2978_p9), %s2350_s15, 4294966272  ;;  %s24_s26 = sadd.s32 1, %s3436_s26   ;;  %s4402_s21 = smov %s3420_s22 }
 0x8d4   : > { %p21_p0 = scmp.ge.s32.totalorder %s24_s26, 4   ;;  %s4403_s22 = smov %s3424_s23 }
 0x8d5   : > { %s4404_s23 = smov %s3679_s10  ;;  %s4405_s24 = smov %s3432_s25 }
 0x8d6   : > { %s4406_s25 = smov %s4408_s28  ;;  %23 = sbr.rel (!%p21_p0) target bundleno = 10 (0xa), region = 110 }
 0x8dd   :  { %2355 = vsyncpa [#allocation5], 1 }
 0x8de   :  { %2357 = vsyncpa [#allocation5 + $0x1], 1 }
 0x8df   :  { %2358 = vsyncpa [#allocation8], 1 }
 0x8e0   :  { %2359 = vsyncpa [#allocation11], 1 }
 0x8e1   :  { %2360 = vsyncpa [#allocation6], 1 }
 0x8e2   :  { %2362 = vsyncpa [#allocation6 + $0x1], 1 }

</bundles_post_ra>
